<compile_context>
chip_gen: v7x
topology: tpu7x:2x2x1
jax: 0.10.0
libtpu: 0.0.40
codegen_flags: <defaults>
</compile_context>

<pallas_src>
import jax
import jax.numpy as jnp
from jax.experimental import pallas as pl
from jax.experimental.pallas import tpu as pltpu


def _round_up(x, m):
    return (x + m - 1) // m * m


def _sparse_output_kernel(eps):
    def kernel(x_ref, w_ref, res_ref, params_ref, o_ref, acc_ref):
        k = pl.program_id(1)

        @pl.when(k == 0)
        def _():
            acc_ref[...] = jnp.zeros_like(acc_ref)

        # Partial matmul on the MXU; f32 accumulation regardless of input dtype.
        acc_ref[...] += jnp.dot(x_ref[...], w_ref[...],
                                preferred_element_type=jnp.float32)

        @pl.when(k == pl.num_programs(1) - 1)
        def _():
            bias = params_ref[0:1, :]                 # (1, H) f32
            gamma = params_ref[1:2, :]
            beta = params_ref[2:3, :]
            # Dropout: identity at inference time (eval mode).
            h = acc_ref[...] + bias + res_ref[...].astype(jnp.float32)
            # LayerNorm over last dim (biased variance, as in BertLayerNorm).
            mean = jnp.mean(h, axis=-1, keepdims=True)
            centered = h - mean
            var = jnp.mean(centered * centered, axis=-1, keepdims=True)
            scale = jax.lax.rsqrt(var + eps) * gamma   # fold gamma into scale
            o_ref[...] = (centered * scale + beta).astype(o_ref.dtype)

    return kernel


def sparse_output_forward(hidden_states, input_tensor, w, b, gamma, beta, *,
                          eps=1e-12, tm=256, tk=512,
                          compute_dtype=jnp.bfloat16):
    """hidden_states: [T, I]; input_tensor: [T, H]; w: [I, H]; b,gamma,beta: [H]."""
    T, I = hidden_states.shape
    T2, H = input_tensor.shape
    assert T == T2 and w.shape == (I, H)
    out_dtype = input_tensor.dtype

    # Contraction tile: lane-aligned (multiple of 128), no bigger than padded I.
    tk = min(tk, _round_up(I, 128))
    I_pad = _round_up(I, tk)
    T_pad = _round_up(T, tm)

    # Cast matmul operands to the compute dtype (bf16 by default, f32 accumulate).
    x = hidden_states.astype(compute_dtype)
    w_c = w.astype(compute_dtype)
    if I_pad != I:                      # zero-pad K: contributes nothing to the dot
        x = jnp.pad(x, ((0, 0), (0, I_pad - I)))
        w_c = jnp.pad(w_c, ((0, I_pad - I), (0, 0)))
    res = input_tensor
    if T_pad != T:                      # zero-pad tokens; sliced off below
        x = jnp.pad(x, ((0, T_pad - T), (0, 0)))
        res = jnp.pad(res, ((0, T_pad - T), (0, 0)))

    # Pack bias / gamma / beta into one resident (3, H) f32 block.
    params = jnp.stack([b, gamma, beta]).astype(jnp.float32)

    grid = (T_pad // tm, I_pad // tk)

    itemsize = jnp.dtype(compute_dtype).itemsize
    cost = pl.CostEstimate(
        flops=2 * T_pad * I_pad * H,
        transcendentals=0,
        bytes_accessed=(T_pad * I_pad * itemsize        # activations
                        + I_pad * H * itemsize          # weight
                        + T_pad * H * res.dtype.itemsize  # residual
                        + T_pad * H * jnp.dtype(out_dtype).itemsize  # output
                        + params.size * 4),
    )

    out = pl.pallas_call(
        _sparse_output_kernel(eps),
        out_shape=jax.ShapeDtypeStruct((T_pad, H), out_dtype),
        grid_spec=pltpu.PrefetchScalarGridSpec(
            num_scalar_prefetch=0,
            grid=grid,
            in_specs=[
                pl.BlockSpec((tm, tk), lambda i, k: (i, k)),   # activation tile
                pl.BlockSpec((tk, H), lambda i, k: (k, 0)),    # weight K-tile
                pl.BlockSpec((tm, H), lambda i, k: (i, 0)),    # residual (const over k)
                pl.BlockSpec((3, H), lambda i, k: (0, 0)),     # bias/gamma/beta
            ],
            out_specs=pl.BlockSpec((tm, H), lambda i, k: (i, 0)),
            scratch_shapes=[pltpu.VMEM((tm, H), jnp.float32)],  # f32 accumulator
        ),
        compiler_params=pltpu.CompilerParams(
            dimension_semantics=("parallel", "arbitrary")),
        cost_estimate=cost,
    )(x, w_c, res, params)

    return out[:T]


def reference_forward(hidden_states, input_tensor, w, b, gamma, beta, eps=1e-12):
    h = hidden_states @ w + b
    h = h + input_tensor
    mean = h.mean(-1, keepdims=True)
    var = ((h - mean) ** 2).mean(-1, keepdims=True)
    return gamma * (h - mean) / jnp.sqrt(var + eps) + beta


if __name__ == "__main__":
    # Small config: batch=2, seq=8, intermediate_size=256, hidden_size=128
    batch, seq = 2, 8
    intermediate_size, hidden_size = 256, 128
    eps = 1e-12

    key = jax.random.PRNGKey(0)
    k1, k2, k3, k4 = jax.random.split(key, 4)

    hidden_states = jax.random.normal(
        k1, (batch, seq, intermediate_size), dtype=jnp.float32)
    input_tensor = jax.random.normal(
        k2, (batch, seq, hidden_size), dtype=jnp.float32)

    # Deterministic synthetic parameters (shapes from __init__).
    # nn.Linear(intermediate_size, hidden_size): weight [H, I], bias [H].
    # We keep the transposed weight [I, H] for the kernel's row-major matmul.
    w = (jax.random.normal(k3, (intermediate_size, hidden_size), dtype=jnp.float32)
         * (1.0 / jnp.sqrt(intermediate_size)))
    b = jax.random.normal(k4, (hidden_size,), dtype=jnp.float32) * 0.02
    gamma = jnp.ones((hidden_size,), dtype=jnp.float32)
    beta = jnp.zeros((hidden_size,), dtype=jnp.float32)

    # Flatten batch*seq -> tokens for the kernel.
    hs2d = hidden_states.reshape(batch * seq, intermediate_size)
    res2d = input_tensor.reshape(batch * seq, hidden_size)

    ref = reference_forward(hs2d, res2d, w, b, gamma, beta, eps=eps)

    # 1) f32 compute path: tight check of the kernel math.
    out_f32 = sparse_output_forward(hs2d, res2d, w, b, gamma, beta, eps=eps,
                                    compute_dtype=jnp.float32)
    jax.block_until_ready(out_f32)
    assert jnp.allclose(out_f32, ref, atol=1e-4, rtol=1e-4), "f32 path mismatch"

    # 2) Default bf16-matmul path (f32 accumulation, f32 LayerNorm).
    out_bf16 = sparse_output_forward(hs2d, res2d, w, b, gamma, beta, eps=eps)
    jax.block_until_ready(out_bf16)
    assert jnp.allclose(out_bf16.astype(jnp.float32), ref,
                        atol=3e-2, rtol=3e-2), "bf16 path mismatch"

    out = out_bf16.reshape(batch, seq, hidden_size)
    jax.block_until_ready(out)
    print("KERNEL_OK")
</pallas_src>

<mosaic_0001>
module attributes {stable_mosaic.version = 11 : i64} {
  func.func @kernel(%arg0: i32, %arg1: i32, %arg2: memref<256x256xf32, #tpu.memory_space<vmem>>, %arg3: memref<256x128xf32, #tpu.memory_space<vmem>>, %arg4: memref<256x128xf32, #tpu.memory_space<vmem>>, %arg5: memref<3x128xf32, #tpu.memory_space<vmem>>, %arg6: memref<256x128xf32, #tpu.memory_space<vmem>>, %arg7: memref<256x128xf32, #tpu.memory_space<vmem>>) attributes {dimension_semantics = [#tpu.dimension_semantics<parallel>, #tpu.dimension_semantics<arbitrary>], iteration_bounds = array<i64: 1, 1>, scalar_prefetch = 0 : i64, scratch_operands = 1 : i64, tpu.core_type = #tpu.core_type<tc>, window_params = [{transform_indices = @transform_0, window_bounds = array<i64: 256, 256>}, {transform_indices = @transform_1, window_bounds = array<i64: 256, 128>}, {transform_indices = @transform_2, window_bounds = array<i64: 256, 128>}, {pipeline_mode = #tpu.pipeline_mode<synchronous>, transform_indices = @transform_3, window_bounds = array<i64: 3, 128>}, {transform_indices = @transform_4, window_bounds = array<i64: 256, 128>}]} {
    %c0_i32 = arith.constant 0 : i32
    %0 = arith.cmpi eq, %arg1, %c0_i32 : i32
    %1 = arith.extui %0 : i1 to i32
    %c0_i32_0 = arith.constant 0 : i32
    %2 = arith.cmpi ne, %1, %c0_i32_0 : i32
    scf.if %2 {
      %cst_10 = arith.constant 0.000000e+00 : f32
      %12 = vector.broadcast %cst_10 : f32 to vector<256x128xf32>
      %c0_11 = arith.constant 0 : index
      %c0_12 = arith.constant 0 : index
      %13 = vector.load %arg7[%c0_11, %c0_12] : memref<256x128xf32, #tpu.memory_space<vmem>>, vector<256x128xf32>
      tpu.vector_store %arg7[%c0_11, %c0_12], %12 {strides = array<i32>} : memref<256x128xf32, #tpu.memory_space<vmem>>, vector<256x128xf32>,
    } else {
    }
    %c0 = arith.constant 0 : index
    %c0_1 = arith.constant 0 : index
    %3 = vector.load %arg7[%c0, %c0_1] : memref<256x128xf32, #tpu.memory_space<vmem>>, vector<256x128xf32>
    %c0_2 = arith.constant 0 : index
    %c0_3 = arith.constant 0 : index
    %4 = vector.load %arg2[%c0_2, %c0_3] : memref<256x256xf32, #tpu.memory_space<vmem>>, vector<256x256xf32>
    %c0_4 = arith.constant 0 : index
    %c0_5 = arith.constant 0 : index
    %5 = vector.load %arg3[%c0_4, %c0_5] : memref<256x128xf32, #tpu.memory_space<vmem>>, vector<256x128xf32>
    %cst = arith.constant dense<0.000000e+00> : vector<256x128xf32>
    %6 = tpu.matmul %4, %5, %cst {dimension_numbers = #tpu.dot_dimension_numbers<[1], [0], [0], [1], [0, 0, 1, 1], [], []>} : vector<256x256xf32>, vector<256x128xf32>, vector<256x128xf32> -> vector<256x128xf32>
    %7 = arith.addf %3, %6 : vector<256x128xf32>
    %c0_6 = arith.constant 0 : index
    %c0_7 = arith.constant 0 : index
    %8 = vector.load %arg7[%c0_6, %c0_7] : memref<256x128xf32, #tpu.memory_space<vmem>>, vector<256x128xf32>
    tpu.vector_store %arg7[%c0_6, %c0_7], %7 {strides = array<i32>} : memref<256x128xf32, #tpu.memory_space<vmem>>, vector<256x128xf32>,
    %c0_i32_8 = arith.constant 0 : i32
    %9 = arith.cmpi eq, %arg1, %c0_i32_8 : i32
    %10 = arith.extui %9 : i1 to i32
    %c0_i32_9 = arith.constant 0 : i32
    %11 = arith.cmpi ne, %10, %c0_i32_9 : i32
    scf.if %11 {
      %c0_10 = arith.constant 0 : index
      %c0_11 = arith.constant 0 : index
      %12 = vector.load %arg5[%c0_10, %c0_11] : memref<3x128xf32, #tpu.memory_space<vmem>>, vector<1x128xf32>
      %c1 = arith.constant 1 : index
      %c0_12 = arith.constant 0 : index
      %13 = vector.load %arg5[%c1, %c0_12] : memref<3x128xf32, #tpu.memory_space<vmem>>, vector<1x128xf32>
      %c2 = arith.constant 2 : index
      %c0_13 = arith.constant 0 : index
      %14 = vector.load %arg5[%c2, %c0_13] : memref<3x128xf32, #tpu.memory_space<vmem>>, vector<1x128xf32>
      %c0_14 = arith.constant 0 : index
      %c0_15 = arith.constant 0 : index
      %15 = vector.load %arg7[%c0_14, %c0_15] : memref<256x128xf32, #tpu.memory_space<vmem>>, vector<256x128xf32>
      %16 = vector.broadcast %12 : vector<1x128xf32> to vector<256x128xf32>
      %17 = arith.addf %15, %16 : vector<256x128xf32>
      %c0_16 = arith.constant 0 : index
      %c0_17 = arith.constant 0 : index
      %18 = vector.load %arg4[%c0_16, %c0_17] : memref<256x128xf32, #tpu.memory_space<vmem>>, vector<256x128xf32>
      %19 = arith.addf %17, %18 : vector<256x128xf32>
      %cst_18 = arith.constant dense<0.000000e+00> : vector<256xf32>
      %20 = vector.multi_reduction <add>, %19, %cst_18 [1] : vector<256x128xf32> to vector<256xf32>
      %21 = vector.shape_cast %20 : vector<256xf32> to vector<256x1xf32>
      %cst_19 = arith.constant 1.280000e+02 : f32
      %22 = vector.broadcast %cst_19 : f32 to vector<256x1xf32>
      %23 = arith.divf %21, %22 : vector<256x1xf32>
      %24 = vector.broadcast %23 : vector<256x1xf32> to vector<256x128xf32>
      %25 = arith.subf %19, %24 : vector<256x128xf32>
      %26 = arith.mulf %25, %25 : vector<256x128xf32>
      %cst_20 = arith.constant dense<0.000000e+00> : vector<256xf32>
      %27 = vector.multi_reduction <add>, %26, %cst_20 [1] : vector<256x128xf32> to vector<256xf32>
      %28 = vector.shape_cast %27 : vector<256xf32> to vector<256x1xf32>
      %cst_21 = arith.constant 1.280000e+02 : f32
      %29 = vector.broadcast %cst_21 : f32 to vector<256x1xf32>
      %30 = arith.divf %28, %29 : vector<256x1xf32>
      %cst_22 = arith.constant 9.99999996E-13 : f32
      %31 = vector.broadcast %cst_22 : f32 to vector<256x1xf32>
      %32 = arith.addf %30, %31 : vector<256x1xf32>
      %33 = math.rsqrt %32 : vector<256x1xf32>
      %34 = vector.broadcast %33 : vector<256x1xf32> to vector<256x128xf32>
      %35 = vector.broadcast %13 : vector<1x128xf32> to vector<256x128xf32>
      %36 = arith.mulf %34, %35 : vector<256x128xf32>
      %37 = arith.mulf %25, %36 : vector<256x128xf32>
      %38 = vector.broadcast %14 : vector<1x128xf32> to vector<256x128xf32>
      %39 = arith.addf %37, %38 : vector<256x128xf32>
      %c0_23 = arith.constant 0 : index
      %c0_24 = arith.constant 0 : index
      %40 = vector.load %arg6[%c0_23, %c0_24] : memref<256x128xf32, #tpu.memory_space<vmem>>, vector<256x128xf32>
      tpu.vector_store %arg6[%c0_23, %c0_24], %39 {strides = array<i32>} : memref<256x128xf32, #tpu.memory_space<vmem>>, vector<256x128xf32>,
    } else {
    }
    return
  }
  func.func @transform_0(%arg0: i32, %arg1: i32) -> (i32, i32) {
    %c0_i32 = arith.constant 0 : i32
    return %arg0, %arg1 : i32, i32
  }
  func.func @transform_1(%arg0: i32, %arg1: i32) -> (i32, i32) {
    %c0_i32 = arith.constant 0 : i32
    %c0_i32_0 = arith.constant 0 : i32
    return %arg1, %c0_i32 : i32, i32
  }
  func.func @transform_2(%arg0: i32, %arg1: i32) -> (i32, i32) {
    %c0_i32 = arith.constant 0 : i32
    %c0_i32_0 = arith.constant 0 : i32
    return %arg0, %c0_i32 : i32, i32
  }
  func.func @transform_3(%arg0: i32, %arg1: i32) -> (i32, i32) {
    %c0_i32 = arith.constant 0 : i32
    %c0_i32_0 = arith.constant 0 : i32
    %c0_i32_1 = arith.constant 0 : i32
    return %c0_i32, %c0_i32_0 : i32, i32
  }
  func.func @transform_4(%arg0: i32, %arg1: i32) -> (i32, i32) {
    %c0_i32 = arith.constant 0 : i32
    %c0_i32_0 = arith.constant 0 : i32
    return %arg0, %c0_i32 : i32, i32
  }
}

</mosaic_0001>

<bundles_post_ra>
// kernel: tpu_custom_call.1
= control target key start
LH: loop header
LB: loop body
LE: loop exit
PB: predicated region body
PF: predicated region fallthrough
CT: control target
= control target key end

     0   :  { %9 = vsyncpa [#allocation4], 0  ;;  %s1897_s0 = inlined_call_operand.hbm [shape: f32[256,256], index: 0, kind: input, shape index: {}]   ;;  %s1898_s1 = inlined_call_operand.hbm [shape: f32[256,128], index: 1, kind: input, shape index: {}]   ;;  %s1899_s2 = inlined_call_operand.hbm [shape: f32[256,128], index: 2, kind: input, shape index: {}]   ;;  %s1900_s3 = inlined_call_operand.vmem [shape: f32[3,128], index: 3, kind: input, shape index: {}]   ;;  %s1901_s4 = inlined_call_operand.hbm [shape: f32[256,128], index: 4, kind: output, shape index: {}]  }
   0x1   :  { %10 = vsyncpa [#allocation7], 0 }
   0x2   :  { %11 = vsyncpa [#allocation5], 0  ;;  %s1375_s15 = smov [#allocation6]   ;;  %s1281_s19 = scalar_lea.hbm %s1898_s1, 4096 }
   0x3   :  { %s29_s16 = sshll.u32 %s1375_s15, 4  ;;  %p1282_p0 = scmp.ne.s32.totalorder %s1898_s1, %s1281_s19  ;;  %s30_s16 = int_to_ptr.vmem [resolvable:$true] %s29_s16 }
   0x4   :  { %p1285_p1 = scmp.lt.u32.totalorder %s1281_s19, %s1898_s1 }
   0x6   :  { %p1287_p2 = pnand %p1285_p1, %p1282_p0 }
   0x8   :  { %1290 = shalt.err (!%p1287_p2)
}
   0x9   :  { %s1291_s24 = scalar_lea.vmem %s30_s16, 4096  ;;  %p1296_p4 = scmp.lt.s32.totalorder %s30_s16, %s30_s16 }
   0xa   :  { %p1292_p3 = scmp.ne.s32.totalorder %s30_s16, %s1291_s24  ;;  %p1297_p5 = scmp.lt.s32.totalorder %s1291_s24, %s1291_s24 }
   0xc   :  { %p1298_p6 = por %p1297_p5, %p1296_p4 }
   0xe   :  { %p1299_p7 = pnand %p1298_p6, %p1292_p3 }
  0x10   :  { %1302 = shalt.err (!%p1299_p7)
}
  0x11   :  { %s1376_s25 = smov 128   ;;  %s1377_s26 = smov 8  }
  0x12   :  { %35 = dma.hbm_to_vmem [thread:$0]  %s1898_s1, 4096, %s30_s16, [#allocation7], %s1376_s25, %s1376_s25, %s1377_s26  }
  0x13   :  { %s1378_s29 = smov [#allocation3]   ;;  %s1303_s7 = scalar_lea.hbm %s1897_s0, 8192 }
  0x14   :  { %s17_s30 = sshll.u32 %s1378_s29, 4  ;;  %p1304_p8 = scmp.ne.s32.totalorder %s1897_s0, %s1303_s7  ;;  %s18_s30 = int_to_ptr.vmem [resolvable:$true] %s17_s30 }
  0x15   :  { %p1307_p9 = scmp.lt.u32.totalorder %s1303_s7, %s1897_s0 }
  0x17   :  { %p1309_p10 = pnand %p1307_p9, %p1304_p8 }
  0x19   :  { %1312 = shalt.err (!%p1309_p10)
}
  0x1a   :  { %s1313_s12 = scalar_lea.vmem %s18_s30, 8192  ;;  %p1318_p12 = scmp.lt.s32.totalorder %s18_s30, %s18_s30 }
  0x1b   :  { %p1314_p11 = scmp.ne.s32.totalorder %s18_s30, %s1313_s12  ;;  %p1319_p13 = scmp.lt.s32.totalorder %s1313_s12, %s1313_s12 }
  0x1d   :  { %p1320_p0 = por %p1319_p13, %p1318_p12 }
  0x1f   :  { %p1321_p1 = pnand %p1320_p0, %p1314_p11 }
  0x21   :  { %1324 = shalt.err (!%p1321_p1)
}
  0x22   :  { %s1379_s1 = smov 256   ;;  %s1380_s13 = smov 16  }
  0x23   :  { %23 = dma.hbm_to_vmem [thread:$0]  %s1897_s0, 8192, %s18_s30, [#allocation4], %s1379_s1, %s1379_s1, %s1380_s13  }
  0x24   :  { %s1381_s16 = smov [#allocation8]   ;;  %s1325_s20 = scalar_lea.hbm %s1899_s2, 4096 }
  0x25   :  { %s41_s17 = sshll.u32 %s1381_s16, 4  ;;  %p1326_p2 = scmp.ne.s32.totalorder %s1899_s2, %s1325_s20  ;;  %s42_s17 = int_to_ptr.vmem [resolvable:$true] %s41_s17 }
  0x26   :  { %p1329_p3 = scmp.lt.u32.totalorder %s1325_s20, %s1899_s2 }
  0x28   :  { %p1331_p4 = pnand %p1329_p3, %p1326_p2 }
  0x2a   :  { %1334 = shalt.err (!%p1331_p4)
}
  0x2b   :  { %s1335_s27 = scalar_lea.vmem %s42_s17, 4096  ;;  %p1340_p6 = scmp.lt.s32.totalorder %s42_s17, %s42_s17 }
  0x2c   :  { %p1336_p5 = scmp.ne.s32.totalorder %s42_s17, %s1335_s27  ;;  %p1341_p7 = scmp.lt.s32.totalorder %s1335_s27, %s1335_s27 }
  0x2e   :  { %p1342_p8 = por %p1341_p7, %p1340_p6 }
  0x30   :  { %p1343_p9 = pnand %p1342_p8, %p1336_p5 }
  0x32   :  { %1346 = shalt.err (!%p1343_p9)
}
  0x33   :  { %47 = dma.hbm_to_vmem [thread:$0]  %s1899_s2, 4096, %s42_s17, [#allocation7], %s1376_s25, %s1376_s25, %s1377_s26  }
  0x34   :  { %1369 = dma.done.wait [#allocation4], 8192  }
  0x35   :  { %1370 = vsyncadd [#allocation4], 4294959104 }
  0x36   :  { %1371 = dma.done.wait [#allocation7], 8192  }
  0x37   :  { %1372 = vsyncadd [#allocation7], 4294959104  ;;  %v1382_v0 = vmov 0.0|0.0   ;;  %v191_v1 = vld [vmem:[#allocation6] sm:$0xff]  ;;  %v192_v2 = vld [vmem:[#allocation6 + $0x8] sm:$0xff] }
  0x38   :  { %1128 = vmatprep.subr.bf16.mxu0 %v1382_v0  ;;  %1176 = vmatprep.subr.bf16.mxu1 %v1382_v0  ;;  %v193_v3 = vld [vmem:[#allocation6 + $0x10] sm:$0xff]  ;;  %v1129_v4 = vpack.c.bf16 %v192_v2, %v191_v1  ;;  %v194_v5 = vld [vmem:[#allocation6 + $0x18] sm:$0xff]  ;;  %v195_v7 = vld [vmem:[#allocation6 + $0x20] sm:$0xff] }
  0x39   :  { %v1132_v6 = vpack.c.bf16 %v194_v5, %v193_v3  ;;  %v196_v8 = vld [vmem:[#allocation6 + $0x28] sm:$0xff]  ;;  %v197_v10 = vld [vmem:[#allocation6 + $0x30] sm:$0xff]  ;;  %v198_v11 = vld [vmem:[#allocation6 + $0x38] sm:$0xff] }
  0x3a   :  { %1130 = vmatpush1.bf16.msra.mxu0 %v1129_v4  ;;  %1192 = vmatpush1.bf16.msra.mxu1 %v1129_v4  ;;  %v1135_v9 = vpack.c.bf16 %v196_v8, %v195_v7  ;;  %v128_v12 = vld [vmem:[#allocation3 + $0x8] sm:$0xff]  ;;  %v1138_v13 = vpack.c.bf16 %v198_v11, %v197_v10  ;;  %v199_v15 = vld [vmem:[#allocation6 + $0x40] sm:$0xff]  ;;  %v201_v18 = vld [vmem:[#allocation6 + $0x50] sm:$0xff] }
  0x3b   :  { %1131 = vmatprep.subr.bf16.mxu0 %v1382_v0  ;;  %1177 = vmatprep.subr.bf16.mxu1 %v1382_v0  ;;  %v160_v14 = vld [vmem:[#allocation3 + $0x108] sm:$0xff]  ;;  %v202_v19 = vld [vmem:[#allocation6 + $0x58] sm:$0xff]  ;;  %v203_v21 = vld [vmem:[#allocation6 + $0x60] sm:$0xff] }
  0x3c   :  { %v200_v16 = vld [vmem:[#allocation6 + $0x48] sm:$0xff]  ;;  %287 = vmatprep.mubr.f32.mxu0 %v128_v12  ;;  %367 = vmatprep.mubr.f32.mxu1 %v160_v14  ;;  %v1144_v20 = vpack.c.bf16 %v202_v19, %v201_v18  ;;  %v205_v24 = vld [vmem:[#allocation6 + $0x70] sm:$0xff]  ;;  %v206_v25 = vld [vmem:[#allocation6 + $0x78] sm:$0xff] }
  0x3d   :  { %v1141_v17 = vpack.c.bf16 %v200_v16, %v199_v15  ;;  %v204_v22 = vld [vmem:[#allocation6 + $0x68] sm:$0xff]  ;;  %v1150_v26 = vpack.c.bf16 %v206_v25, %v205_v24  ;;  %v207_v27 = vld [vmem:[#allocation6 + $0x80] sm:$0xff]  ;;  %v209_v30 = vld [vmem:[#allocation6 + $0x90] sm:$0xff] }
  0x3e   :  { %1133 = vmatpush1.bf16.msra.mxu0 %v1132_v6  ;;  %1193 = vmatpush1.bf16.msra.mxu1 %v1132_v6  ;;  %v1147_v23 = vpack.c.bf16 %v204_v22, %v203_v21  ;;  %v208_v28 = vld [vmem:[#allocation6 + $0x88] sm:$0xff]  ;;  %v210_v31 = vld [vmem:[#allocation6 + $0x98] sm:$0xff]  ;;  %v211_v33 = vld [vmem:[#allocation6 + $0xa0] sm:$0xff] }
  0x3f   :  { %1134 = vmatprep.subr.bf16.mxu0 %v1382_v0  ;;  %1178 = vmatprep.subr.bf16.mxu1 %v1382_v0  ;;  %v1153_v29 = vpack.c.bf16 %v208_v28, %v207_v27  ;;  %v1156_v32 = vpack.c.bf16 %v210_v31, %v209_v30  ;;  %v212_v34 = vld [vmem:[#allocation6 + $0xa8] sm:$0xff]  ;;  %v213_v36 = vld [vmem:[#allocation6 + $0xb0] sm:$0xff]  ;;  %v214_v37 = vld [vmem:[#allocation6 + $0xb8] sm:$0xff] }
  0x40   :  { %v1159_v35 = vpack.c.bf16 %v212_v34, %v211_v33  ;;  %v1162_v38 = vpack.c.bf16 %v214_v37, %v213_v36  ;;  %v215_v39 = vld [vmem:[#allocation6 + $0xc0] sm:$0xff]  ;;  %v216_v40 = vld [vmem:[#allocation6 + $0xc8] sm:$0xff]  ;;  %v217_v42 = vld [vmem:[#allocation6 + $0xd0] sm:$0xff] }
  0x41   :  { %v1165_v41 = vpack.c.bf16 %v216_v40, %v215_v39  ;;  %v218_v43 = vld [vmem:[#allocation6 + $0xd8] sm:$0xff]  ;;  %v219_v45 = vld [vmem:[#allocation6 + $0xe0] sm:$0xff]  ;;  %v220_v46 = vld [vmem:[#allocation6 + $0xe8] sm:$0xff] }
  0x42   :  { %1136 = vmatpush1.bf16.msra.mxu0 %v1135_v9  ;;  %1194 = vmatpush1.bf16.msra.mxu1 %v1135_v9  ;;  %v1168_v44 = vpack.c.bf16 %v218_v43, %v217_v42  ;;  %v1171_v47 = vpack.c.bf16 %v220_v46, %v219_v45  ;;  %v221_v48 = vld [vmem:[#allocation6 + $0xf0] sm:$0xff]  ;;  %v222_v49 = vld [vmem:[#allocation6 + $0xf8] sm:$0xff]  ;;  %v127_v51 = vld [vmem:[#allocation3] sm:$0xff] }
  0x43   :  { %1137 = vmatprep.subr.bf16.mxu0 %v1382_v0  ;;  %1179 = vmatprep.subr.bf16.mxu1 %v1382_v0  ;;  %v1174_v50 = vpack.c.bf16 %v222_v49, %v221_v48  ;;  %v159_v52 = vld [vmem:[#allocation3 + $0x100] sm:$0xff]  ;;  %v130_v53 = vld [vmem:[#allocation3 + $0x18] sm:$0xff]  ;;  %v129_v55 = vld [vmem:[#allocation3 + $0x10] sm:$0xff] }
  0x44   :  { %v162_v54 = vld [vmem:[#allocation3 + $0x118] sm:$0xff]  ;;  %v161_v56 = vld [vmem:[#allocation3 + $0x110] sm:$0xff]  ;;  %v132_v57 = vld [vmem:[#allocation3 + $0x28] sm:$0xff] }
  0x45   :  { %v164_v58 = vld [vmem:[#allocation3 + $0x128] sm:$0xff]  ;;  %v131_v59 = vld [vmem:[#allocation3 + $0x20] sm:$0xff]  ;;  %v134_v61 = vld [vmem:[#allocation3 + $0x38] sm:$0xff] }
  0x46   :  { %1139 = vmatpush1.bf16.msra.mxu0 %v1138_v13  ;;  %1195 = vmatpush1.bf16.msra.mxu1 %v1138_v13  ;;  %v163_v60 = vld [vmem:[#allocation3 + $0x120] sm:$0xff]  ;;  %v166_v62 = vld [vmem:[#allocation3 + $0x138] sm:$0xff]  ;;  %v133_v63 = vld [vmem:[#allocation3 + $0x30] sm:$0xff] }
  0x47   :  { %1140 = vmatprep.subr.bf16.mxu0 %v1382_v0  ;;  %1180 = vmatprep.subr.bf16.mxu1 %v1382_v0  ;;  %v136_v1 = vld [vmem:[#allocation3 + $0x48] sm:$0xff]  ;;  %v135_v3 = vld [vmem:[#allocation3 + $0x40] sm:$0xff]  ;;  %v138_v5 = vld [vmem:[#allocation3 + $0x58] sm:$0xff] }
  0x48   :  { %v168_v2 = vld [vmem:[#allocation3 + $0x148] sm:$0xff]  ;;  %v167_v4 = vld [vmem:[#allocation3 + $0x140] sm:$0xff]  ;;  %v170_v6 = vld [vmem:[#allocation3 + $0x158] sm:$0xff] }
  0x49   :  { %v137_v7 = vld [vmem:[#allocation3 + $0x50] sm:$0xff]  ;;  %v140_v9 = vld [vmem:[#allocation3 + $0x68] sm:$0xff]  ;;  %v139_v11 = vld [vmem:[#allocation3 + $0x60] sm:$0xff] }
  0x4a   :  { %1142 = vmatpush1.bf16.msra.mxu0 %v1141_v17  ;;  %1196 = vmatpush1.bf16.msra.mxu1 %v1141_v17  ;;  %v169_v8 = vld [vmem:[#allocation3 + $0x150] sm:$0xff]  ;;  %v172_v10 = vld [vmem:[#allocation3 + $0x168] sm:$0xff]  ;;  %v171_v12 = vld [vmem:[#allocation3 + $0x160] sm:$0xff] }
  0x4b   :  { %1143 = vmatprep.subr.bf16.mxu0 %v1382_v0  ;;  %1181 = vmatprep.subr.bf16.mxu1 %v1382_v0  ;;  %v142_v13 = vld [vmem:[#allocation3 + $0x78] sm:$0xff]  ;;  %v141_v15 = vld [vmem:[#allocation3 + $0x70] sm:$0xff]  ;;  %v144_v17 = vld [vmem:[#allocation3 + $0x88] sm:$0xff] }
  0x4c   :  { %v174_v14 = vld [vmem:[#allocation3 + $0x178] sm:$0xff]  ;;  %v173_v16 = vld [vmem:[#allocation3 + $0x170] sm:$0xff]  ;;  %v176_v18 = vld [vmem:[#allocation3 + $0x188] sm:$0xff] }
  0x4d   :  { %v143_v19 = vld [vmem:[#allocation3 + $0x80] sm:$0xff]  ;;  %v146_v21 = vld [vmem:[#allocation3 + $0x98] sm:$0xff]  ;;  %v177_v24 = vld [vmem:[#allocation3 + $0x190] sm:$0xff] }
  0x4e   :  { %1145 = vmatpush1.bf16.msra.mxu0 %v1144_v20  ;;  %1197 = vmatpush1.bf16.msra.mxu1 %v1144_v20  ;;  %v175_v20 = vld [vmem:[#allocation3 + $0x180] sm:$0xff]  ;;  %v178_v22 = vld [vmem:[#allocation3 + $0x198] sm:$0xff]  ;;  %v148_v25 = vld [vmem:[#allocation3 + $0xa8] sm:$0xff] }
  0x4f   :  { %1146 = vmatprep.subr.bf16.mxu0 %v1382_v0  ;;  %1182 = vmatprep.subr.bf16.mxu1 %v1382_v0  ;;  %v147_v27 = vld [vmem:[#allocation3 + $0xa0] sm:$0xff]  ;;  %v182_v30 = vld [vmem:[#allocation3 + $0x1b8] sm:$0xff]  ;;  %v149_v31 = vld [vmem:[#allocation3 + $0xb0] sm:$0xff] }
  0x50   :  { %v179_v28 = vld [vmem:[#allocation3 + $0x1a0] sm:$0xff]  ;;  %v152_v33 = vld [vmem:[#allocation3 + $0xc8] sm:$0xff]  ;;  %v154_v37 = vld [vmem:[#allocation3 + $0xd8] sm:$0xff] }
  0x51   :  { %v184_v34 = vld [vmem:[#allocation3 + $0x1c8] sm:$0xff]  ;;  %v183_v36 = vld [vmem:[#allocation3 + $0x1c0] sm:$0xff]  ;;  %v153_v39 = vld [vmem:[#allocation3 + $0xd0] sm:$0xff] }
  0x52   :  { %1148 = vmatpush1.bf16.msra.mxu0 %v1147_v23  ;;  %1198 = vmatpush1.bf16.msra.mxu1 %v1147_v23  ;;  %v145_v23 = vld [vmem:[#allocation3 + $0x90] sm:$0xff]  ;;  %v188_v42 = vld [vmem:[#allocation3 + $0x1e8] sm:$0xff]  ;;  %v155_v43 = vld [vmem:[#allocation3 + $0xe0] sm:$0xff] }
  0x53   :  { %1149 = vmatprep.subr.bf16.mxu0 %v1382_v0  ;;  %1183 = vmatprep.subr.bf16.mxu1 %v1382_v0  ;;  %v185_v40 = vld [vmem:[#allocation3 + $0x1d0] sm:$0xff]  ;;  %v158_v45 = vld [vmem:[#allocation3 + $0xf8] sm:$0xff]  ;;  %v1486_v49 = vld [vmem:[%s1900_s3] ss:$0 sm:$0xff] }
  0x54   :  { %v190_v46 = vld [vmem:[#allocation3 + $0x1f8] sm:$0xff]  ;;  %v189_v48 = vld [vmem:[#allocation3 + $0x1f0] sm:$0xff] }
  0x56   :  { %1151 = vmatpush1.bf16.msra.mxu0 %v1150_v26  ;;  %1199 = vmatpush1.bf16.msra.mxu1 %v1150_v26  ;;  %v180_v26 = vld [vmem:[#allocation3 + $0x1a8] sm:$0xff] }
  0x57   :  { %1152 = vmatprep.subr.bf16.mxu0 %v1382_v0  ;;  %1184 = vmatprep.subr.bf16.mxu1 %v1382_v0 }
  0x5a   :  { %1154 = vmatpush1.bf16.msra.mxu0 %v1153_v29  ;;  %1200 = vmatpush1.bf16.msra.mxu1 %v1153_v29  ;;  %v150_v29 = vld [vmem:[#allocation3 + $0xb8] sm:$0xff] }
  0x5b   :  { %1155 = vmatprep.subr.bf16.mxu0 %v1382_v0  ;;  %1185 = vmatprep.subr.bf16.mxu1 %v1382_v0 }
  0x5e   :  { %1157 = vmatpush1.bf16.msra.mxu0 %v1156_v32  ;;  %1201 = vmatpush1.bf16.msra.mxu1 %v1156_v32  ;;  %v181_v32 = vld [vmem:[#allocation3 + $0x1b0] sm:$0xff] }
  0x5f   :  { %1158 = vmatprep.subr.bf16.mxu0 %v1382_v0  ;;  %1186 = vmatprep.subr.bf16.mxu1 %v1382_v0 }
  0x62   :  { %1160 = vmatpush1.bf16.msra.mxu0 %v1159_v35  ;;  %1202 = vmatpush1.bf16.msra.mxu1 %v1159_v35  ;;  %v151_v35 = vld [vmem:[#allocation3 + $0xc0] sm:$0xff] }
  0x63   :  { %1161 = vmatprep.subr.bf16.mxu0 %v1382_v0  ;;  %1187 = vmatprep.subr.bf16.mxu1 %v1382_v0 }
  0x66   :  { %1163 = vmatpush1.bf16.msra.mxu0 %v1162_v38  ;;  %1203 = vmatpush1.bf16.msra.mxu1 %v1162_v38  ;;  %v186_v38 = vld [vmem:[#allocation3 + $0x1d8] sm:$0xff] }
  0x67   :  { %1164 = vmatprep.subr.bf16.mxu0 %v1382_v0  ;;  %1188 = vmatprep.subr.bf16.mxu1 %v1382_v0 }
  0x6a   :  { %1166 = vmatpush1.bf16.msra.mxu0 %v1165_v41  ;;  %1204 = vmatpush1.bf16.msra.mxu1 %v1165_v41  ;;  %v156_v41 = vld [vmem:[#allocation3 + $0xe8] sm:$0xff] }
  0x6b   :  { %1167 = vmatprep.subr.bf16.mxu0 %v1382_v0  ;;  %1189 = vmatprep.subr.bf16.mxu1 %v1382_v0 }
  0x6e   :  { %1169 = vmatpush1.bf16.msra.mxu0 %v1168_v44  ;;  %1205 = vmatpush1.bf16.msra.mxu1 %v1168_v44  ;;  %v187_v44 = vld [vmem:[#allocation3 + $0x1e0] sm:$0xff] }
  0x6f   :  { %1170 = vmatprep.subr.bf16.mxu0 %v1382_v0  ;;  %1190 = vmatprep.subr.bf16.mxu1 %v1382_v0 }
  0x72   :  { %1172 = vmatpush1.bf16.msra.mxu0 %v1171_v47  ;;  %1206 = vmatpush1.bf16.msra.mxu1 %v1171_v47  ;;  %v157_v47 = vld [vmem:[#allocation3 + $0xf0] sm:$0xff] }
  0x73   :  { %1173 = vmatprep.subr.bf16.mxu0 %v1382_v0  ;;  %1191 = vmatprep.subr.bf16.mxu1 %v1382_v0  ;;  %v165_v0 = vld [vmem:[#allocation3 + $0x130] sm:$0xff] }
  0x76   :  { %1175 = vmatpush1.bf16.msra.mxu0 %v1174_v50  ;;  %1207 = vmatpush1.bf16.msra.mxu1 %v1174_v50 }
  0x79   :  { %288 = vmatmul.mubr.f32.vlgmr.msra.gmra.mrb[0].mxu0 %v127_v51  ;;  %368 = vmatmul.mubr.f32.vlgmr.msra.gmra.mrb[0].mxu1 %v159_v52  ;;  %v586_v52 = vld [vmem:[#allocation8] sm:$0xff] }
  0x7a   :  { %292 = vmatprep.mubr.f32.mxu0 %v130_v53  ;;  %372 = vmatprep.mubr.f32.mxu1 %v162_v54 }
  0x7d   :  { %293 = vmatmul.mubr.f32.gmra.mrb[2].mxu0 %v129_v55  ;;  %373 = vmatmul.mubr.f32.gmra.mrb[2].mxu1 %v161_v56 }
  0x7e   :  { %297 = vmatprep.mubr.f32.mxu0 %v132_v57  ;;  %377 = vmatprep.mubr.f32.mxu1 %v164_v58  ;;  %v602_v57 = vld [vmem:[#allocation8 + $0x80] sm:$0xff] }
  0x81   :  { %298 = vmatmul.mubr.f32.gmra.mrb[4].mxu0 %v131_v59  ;;  %378 = vmatmul.mubr.f32.gmra.mrb[4].mxu1 %v163_v60 }
  0x82   :  { %302 = vmatprep.mubr.f32.mxu0 %v134_v61  ;;  %382 = vmatprep.mubr.f32.mxu1 %v166_v62  ;;  %v603_v61 = vld [vmem:[#allocation8 + $0x88] sm:$0xff] }
  0x85   :  { %303 = vmatmul.mubr.f32.gmra.mrb[6].mxu0 %v133_v63  ;;  %383 = vmatmul.mubr.f32.gmra.mrb[6].mxu1 %v165_v0 }
  0x86   :  { %307 = vmatprep.mubr.f32.mxu0 %v136_v1  ;;  %387 = vmatprep.mubr.f32.mxu1 %v168_v2 }
  0x89   :  { %308 = vmatmul.mubr.f32.gmra.mrb[8].mxu0 %v135_v3  ;;  %388 = vmatmul.mubr.f32.gmra.mrb[8].mxu1 %v167_v4  ;;  %v587_v3 = vld [vmem:[#allocation8 + $0x8] sm:$0xff] }
  0x8a   :  { %312 = vmatprep.mubr.f32.mxu0 %v138_v5  ;;  %392 = vmatprep.mubr.f32.mxu1 %v170_v6 }
  0x8d   :  { %313 = vmatmul.mubr.f32.gmra.mrb[10].mxu0 %v137_v7  ;;  %393 = vmatmul.mubr.f32.gmra.mrb[10].mxu1 %v169_v8  ;;  %v588_v7 = vld [vmem:[#allocation8 + $0x10] sm:$0xff] }
  0x8e   :  { %317 = vmatprep.mubr.f32.mxu0 %v140_v9  ;;  %397 = vmatprep.mubr.f32.mxu1 %v172_v10 }
  0x91   :  { %318 = vmatmul.mubr.f32.gmra.mrb[12].mxu0 %v139_v11  ;;  %398 = vmatmul.mubr.f32.gmra.mrb[12].mxu1 %v171_v12 }
  0x92   :  { %322 = vmatprep.mubr.f32.mxu0 %v142_v13  ;;  %402 = vmatprep.mubr.f32.mxu1 %v174_v14  ;;  %v604_v13 = vld [vmem:[#allocation8 + $0x90] sm:$0xff] }
  0x95   :  { %323 = vmatmul.mubr.f32.gmra.mrb[14].mxu0 %v141_v15  ;;  %403 = vmatmul.mubr.f32.gmra.mrb[14].mxu1 %v173_v16 }
  0x96   :  { %327 = vmatprep.mubr.f32.mxu0 %v144_v17  ;;  %407 = vmatprep.mubr.f32.mxu1 %v176_v18  ;;  %v589_v17 = vld [vmem:[#allocation8 + $0x18] sm:$0xff] }
  0x99   :  { %328 = vmatmul.mubr.f32.gmra.mrb[16].mxu0 %v143_v19  ;;  %408 = vmatmul.mubr.f32.gmra.mrb[16].mxu1 %v175_v20 }
  0x9a   :  { %332 = vmatprep.mubr.f32.mxu0 %v146_v21  ;;  %412 = vmatprep.mubr.f32.mxu1 %v178_v22 }
  0x9d   :  { %333 = vmatmul.mubr.f32.gmra.mrb[18].mxu0 %v145_v23  ;;  %413 = vmatmul.mubr.f32.gmra.mrb[18].mxu1 %v177_v24  ;;  %v605_v23 = vld [vmem:[#allocation8 + $0x98] sm:$0xff] }
  0x9e   :  { %337 = vmatprep.mubr.f32.mxu0 %v148_v25  ;;  %417 = vmatprep.mubr.f32.mxu1 %v180_v26 }
  0xa1   :  { %338 = vmatmul.mubr.f32.gmra.mrb[20].mxu0 %v147_v27  ;;  %418 = vmatmul.mubr.f32.gmra.mrb[20].mxu1 %v179_v28  ;;  %v590_v27 = vld [vmem:[#allocation8 + $0x20] sm:$0xff] }
  0xa2   :  { %342 = vmatprep.mubr.f32.mxu0 %v150_v29  ;;  %422 = vmatprep.mubr.f32.mxu1 %v182_v30 }
  0xa5   :  { %343 = vmatmul.mubr.f32.gmra.mrb[22].mxu0 %v149_v31  ;;  %423 = vmatmul.mubr.f32.gmra.mrb[22].mxu1 %v181_v32 }
  0xa6   :  { %347 = vmatprep.mubr.f32.mxu0 %v152_v33  ;;  %427 = vmatprep.mubr.f32.mxu1 %v184_v34  ;;  %v606_v33 = vld [vmem:[#allocation8 + $0xa0] sm:$0xff] }
  0xa9   :  { %348 = vmatmul.mubr.f32.gmra.mrb[24].mxu0 %v151_v35  ;;  %428 = vmatmul.mubr.f32.gmra.mrb[24].mxu1 %v183_v36 }
  0xaa   :  { %352 = vmatprep.mubr.f32.mxu0 %v154_v37  ;;  %432 = vmatprep.mubr.f32.mxu1 %v186_v38  ;;  %v591_v37 = vld [vmem:[#allocation8 + $0x28] sm:$0xff] }
  0xad   :  { %353 = vmatmul.mubr.f32.gmra.mrb[26].mxu0 %v153_v39  ;;  %433 = vmatmul.mubr.f32.gmra.mrb[26].mxu1 %v185_v40 }
  0xae   :  { %357 = vmatprep.mubr.f32.mxu0 %v156_v41  ;;  %437 = vmatprep.mubr.f32.mxu1 %v188_v42 }
  0xb1   :  { %358 = vmatmul.mubr.f32.gmra.mrb[28].mxu0 %v155_v43  ;;  %438 = vmatmul.mubr.f32.gmra.mrb[28].mxu1 %v187_v44  ;;  %v607_v43 = vld [vmem:[#allocation8 + $0xa8] sm:$0xff] }
  0xb2   :  { %362 = vmatprep.mubr.f32.mxu0 %v158_v45  ;;  %442 = vmatprep.mubr.f32.mxu1 %v190_v46 }
  0xb5   :  { %363 = vmatmul.mubr.f32.gmra.mrb[30].mxu0 %v157_v47  ;;  %443 = vmatmul.mubr.f32.gmra.mrb[30].mxu1 %v189_v48  ;;  %v592_v47 = vld [vmem:[#allocation8 + $0x30] sm:$0xff] }
 0x14c   :  { %v289_v50 = vpop.f32.mrb[0].mxu0  ;;  %v369_v51 = vpop.f32.mrb[0].mxu1 }
 0x14d   :  { %v554_v53 = vadd.f32 %v1486_v49, %v289_v50  ;;  %v291_v54 = vpop.f32.mrb[1].mxu0  ;;  %v570_v55 = vadd.f32 %v1486_v49, %v369_v51  ;;  %v371_v56 = vpop.f32.mrb[1].mxu1 }
 0x14e   :  { %v608_v54 = vld [vmem:[#allocation8 + $0xb0] sm:$0xff] }
 0x14f   :  { %v1490_v58 = vadd.f32 %v586_v52, %v554_v53  ;;  %v1495_v2 = vadd.f32 %v602_v57, %v570_v55 }
 0x150   :  { %v374_v59 = vpop.f32.mrb[2].mxu1  ;;  %v294_v60 = vpop.f32.mrb[2].mxu0 }
 0x151   :  { %v571_v62 = vadd.f32 %v1486_v49, %v374_v59  ;;  %650 = vadd.xlane.f32.xlu0 %v1490_v58  ;;  %v555_v63 = vadd.f32 %v1486_v49, %v294_v60  ;;  %v296_v0 = vpop.f32.mrb[3].mxu0  ;;  %v376_v1 = vpop.f32.mrb[3].mxu1  ;;  %v593_v59 = vld [vmem:[#allocation8 + $0x38] sm:$0xff] }
 0x152   :  { %v609_v1 = vld [vmem:[#allocation8 + $0xb8] sm:$0xff] }
 0x153   :  { %v1497_v4 = vadd.f32 %v603_v61, %v571_v62  ;;  %v1503_v11 = vadd.f32 %v587_v3, %v555_v63 }
 0x154   :  { %v299_v5 = vpop.f32.mrb[4].mxu0  ;;  %v379_v6 = vpop.f32.mrb[4].mxu1 }
 0x155   :  { %v556_v8 = vadd.f32 %v1486_v49, %v299_v5  ;;  %684 = vadd.xlane.f32.xlu1 %v1497_v4  ;;  %682 = vadd.xlane.f32.xlu0 %v1495_v2  ;;  %v301_v9 = vpop.f32.mrb[5].mxu0  ;;  %v572_v10 = vadd.f32 %v1486_v49, %v379_v6  ;;  %v381_v12 = vpop.f32.mrb[5].mxu1 }
 0x157   :  { %v1505_v14 = vadd.f32 %v588_v7, %v556_v8  ;;  %v1511_v21 = vadd.f32 %v604_v13, %v572_v10  ;;  %v594_v7 = vld [vmem:[#allocation8 + $0x40] sm:$0xff] }
 0x158   :  { %v304_v15 = vpop.f32.mrb[6].mxu0  ;;  %v384_v16 = vpop.f32.mrb[6].mxu1 }
 0x159   :  { %v557_v18 = vadd.f32 %v1486_v49, %v304_v15  ;;  %652 = vadd.xlane.f32.xlu0 %v1503_v11  ;;  %654 = vadd.xlane.f32.xlu1 %v1505_v14  ;;  %v306_v19 = vpop.f32.mrb[7].mxu0  ;;  %v573_v20 = vadd.f32 %v1486_v49, %v384_v16  ;;  %v386_v22 = vpop.f32.mrb[7].mxu1  ;;  %v610_v15 = vld [vmem:[#allocation8 + $0xc0] sm:$0xff] }
 0x15a   :  { %v595_v19 = vld [vmem:[#allocation8 + $0x48] sm:$0xff] }
 0x15b   :  { %v1513_v24 = vadd.f32 %v589_v17, %v557_v18  ;;  %v1519_v31 = vadd.f32 %v605_v23, %v573_v20 }
 0x15c   :  { %v309_v25 = vpop.f32.mrb[8].mxu0  ;;  %v389_v26 = vpop.f32.mrb[8].mxu1 }
 0x15d   :  { %v558_v28 = vadd.f32 %v1486_v49, %v309_v25  ;;  %686 = vadd.xlane.f32.xlu0 %v1511_v21  ;;  %656 = vadd.xlane.f32.xlu1 %v1513_v24  ;;  %v311_v29 = vpop.f32.mrb[9].mxu0  ;;  %v574_v30 = vadd.f32 %v1486_v49, %v389_v26  ;;  %v391_v32 = vpop.f32.mrb[9].mxu1 }
 0x15e   :  { %v596_v32 = vld [vmem:[#allocation8 + $0x50] sm:$0xff] }
 0x15f   :  { %v1521_v34 = vadd.f32 %v590_v27, %v558_v28  ;;  %v1527_v41 = vadd.f32 %v606_v33, %v574_v30  ;;  %v611_v27 = vld [vmem:[#allocation8 + $0xc8] sm:$0xff] }
 0x160   :  { %v314_v35 = vpop.f32.mrb[10].mxu0  ;;  %v394_v36 = vpop.f32.mrb[10].mxu1 }
 0x161   :  { %v559_v38 = vadd.f32 %v1486_v49, %v314_v35  ;;  %688 = vadd.xlane.f32.xlu1 %v1519_v31  ;;  %658 = vadd.xlane.f32.xlu0 %v1521_v34  ;;  %v316_v39 = vpop.f32.mrb[11].mxu0  ;;  %v575_v40 = vadd.f32 %v1486_v49, %v394_v36  ;;  %v396_v42 = vpop.f32.mrb[11].mxu1 }
 0x162   :  { %v612_v39 = vld [vmem:[#allocation8 + $0xd0] sm:$0xff] }
 0x163   :  { %v1529_v44 = vadd.f32 %v591_v37, %v559_v38  ;;  %v1535_v52 = vadd.f32 %v607_v43, %v575_v40 }
 0x164   :  { %v319_v45 = vpop.f32.mrb[12].mxu0  ;;  %v399_v46 = vpop.f32.mrb[12].mxu1 }
 0x165   :  { %v560_v48 = vadd.f32 %v1486_v49, %v319_v45  ;;  %690 = vadd.xlane.f32.xlu0 %v1527_v41  ;;  %660 = vadd.xlane.f32.xlu1 %v1529_v44  ;;  %v321_v50 = vpop.f32.mrb[13].mxu0  ;;  %v576_v51 = vadd.f32 %v1486_v49, %v399_v46  ;;  %v401_v53 = vpop.f32.mrb[13].mxu1  ;;  %v597_v45 = vld [vmem:[#allocation8 + $0x58] sm:$0xff] }
 0x166   :  { %v613_v53 = vld [vmem:[#allocation8 + $0xd8] sm:$0xff] }
 0x167   :  { %v1537_v55 = vadd.f32 %v592_v47, %v560_v48  ;;  %v1543_v63 = vadd.f32 %v608_v54, %v576_v51 }
 0x168   :  { %v324_v56 = vpop.f32.mrb[14].mxu0  ;;  %v404_v57 = vpop.f32.mrb[14].mxu1 }
 0x169   :  { %v561_v60 = vadd.f32 %v1486_v49, %v324_v56  ;;  %692 = vadd.xlane.f32.xlu1 %v1535_v52  ;;  %662 = vadd.xlane.f32.xlu0 %v1537_v55  ;;  %v326_v61 = vpop.f32.mrb[15].mxu0  ;;  %v577_v62 = vadd.f32 %v1486_v49, %v404_v57  ;;  %v406_v0 = vpop.f32.mrb[15].mxu1 }
 0x16b   :  { %v1545_v3 = vadd.f32 %v593_v59, %v561_v60  ;;  %v1551_v12 = vadd.f32 %v609_v1, %v577_v62  ;;  %v598_v59 = vld [vmem:[#allocation8 + $0x60] sm:$0xff] }
 0x16c   :  { %v329_v5 = vpop.f32.mrb[16].mxu0  ;;  %v409_v6 = vpop.f32.mrb[16].mxu1 }
 0x16d   :  { %v562_v8 = vadd.f32 %v1486_v49, %v329_v5  ;;  %694 = vadd.xlane.f32.xlu0 %v1543_v63  ;;  %664 = vadd.xlane.f32.xlu1 %v1545_v3  ;;  %v331_v9 = vpop.f32.mrb[17].mxu0  ;;  %v578_v10 = vadd.f32 %v1486_v49, %v409_v6  ;;  %v411_v13 = vpop.f32.mrb[17].mxu1  ;;  %v614_v5 = vld [vmem:[#allocation8 + $0xe0] sm:$0xff] }
 0x16e   :  { %v599_v9 = vld [vmem:[#allocation8 + $0x68] sm:$0xff] }
 0x16f   :  { %v1553_v16 = vadd.f32 %v594_v7, %v562_v8  ;;  %v1559_v25 = vadd.f32 %v610_v15, %v578_v10 }
 0x170   :  { %v334_v17 = vpop.f32.mrb[18].mxu0  ;;  %v414_v18 = vpop.f32.mrb[18].mxu1 }
 0x171   :  { %v563_v20 = vadd.f32 %v1486_v49, %v334_v17  ;;  %696 = vadd.xlane.f32.xlu1 %v1551_v12  ;;  %666 = vadd.xlane.f32.xlu0 %v1553_v16  ;;  %v336_v22 = vpop.f32.mrb[19].mxu0  ;;  %v579_v23 = vadd.f32 %v1486_v49, %v414_v18  ;;  %v416_v26 = vpop.f32.mrb[19].mxu1 }
 0x172   :  { %v600_v26 = vld [vmem:[#allocation8 + $0x70] sm:$0xff] }
 0x173   :  { %v1561_v28 = vadd.f32 %v595_v19, %v563_v20  ;;  %v1567_v37 = vadd.f32 %v611_v27, %v579_v23  ;;  %v615_v19 = vld [vmem:[#allocation8 + $0xe8] sm:$0xff] }
 0x174   :  { %v339_v29 = vpop.f32.mrb[20].mxu0  ;;  %v419_v30 = vpop.f32.mrb[20].mxu1 }
 0x175   :  { %v564_v33 = vadd.f32 %v1486_v49, %v339_v29  ;;  %698 = vadd.xlane.f32.xlu0 %v1559_v25  ;;  %668 = vadd.xlane.f32.xlu1 %v1561_v28  ;;  %v341_v35 = vpop.f32.mrb[21].mxu0  ;;  %v580_v36 = vadd.f32 %v1486_v49, %v419_v30  ;;  %v421_v38 = vpop.f32.mrb[21].mxu1 }
 0x176   :  { %v616_v35 = vld [vmem:[#allocation8 + $0xf0] sm:$0xff] }
 0x177   :  { %v1569_v40 = vadd.f32 %v596_v32, %v564_v33  ;;  %v1575_v50 = vadd.f32 %v612_v39, %v580_v36 }
 0x178   :  { %v344_v42 = vpop.f32.mrb[22].mxu0  ;;  %v424_v43 = vpop.f32.mrb[22].mxu1 }
 0x179   :  { %v565_v46 = vadd.f32 %v1486_v49, %v344_v42  ;;  %700 = vadd.xlane.f32.xlu1 %v1567_v37  ;;  %670 = vadd.xlane.f32.xlu0 %v1569_v40  ;;  %v346_v47 = vpop.f32.mrb[23].mxu0  ;;  %v581_v48 = vadd.f32 %v1486_v49, %v424_v43  ;;  %v426_v51 = vpop.f32.mrb[23].mxu1  ;;  %v601_v42 = vld [vmem:[#allocation8 + $0x78] sm:$0xff] }
 0x17a   :  { %v617_v51 = vld [vmem:[#allocation8 + $0xf8] sm:$0xff] }
 0x17b   :  { %v1577_v54 = vadd.f32 %v597_v45, %v565_v46  ;;  %v1583_v0 = vadd.f32 %v613_v53, %v581_v48 }
 0x17c   :  { %v349_v56 = vpop.f32.mrb[24].mxu0  ;;  %v429_v57 = vpop.f32.mrb[24].mxu1 }
 0x17d   :  { %v566_v60 = vadd.f32 %v1486_v49, %v349_v56  ;;  %702 = vadd.xlane.f32.xlu0 %v1575_v50  ;;  %672 = vadd.xlane.f32.xlu1 %v1577_v54  ;;  %v351_v61 = vpop.f32.mrb[25].mxu0  ;;  %v582_v62 = vadd.f32 %v1486_v49, %v429_v57  ;;  %v431_v1 = vpop.f32.mrb[25].mxu1 }
 0x17f   :  { %v1585_v6 = vadd.f32 %v598_v59, %v566_v60  ;;  %v1591_v17 = vadd.f32 %v614_v5, %v582_v62 }
 0x180   :  { %v354_v7 = vpop.f32.mrb[26].mxu0  ;;  %v434_v8 = vpop.f32.mrb[26].mxu1 }
 0x181   :  { %v567_v10 = vadd.f32 %v1486_v49, %v354_v7  ;;  %704 = vadd.xlane.f32.xlu1 %v1583_v0  ;;  %674 = vadd.xlane.f32.xlu0 %v1585_v6  ;;  %v356_v13 = vpop.f32.mrb[27].mxu0  ;;  %v583_v15 = vadd.f32 %v1486_v49, %v434_v8  ;;  %v436_v18 = vpop.f32.mrb[27].mxu1 }
 0x183   :  { %v1593_v20 = vadd.f32 %v599_v9, %v567_v10  ;;  %v1599_v32 = vadd.f32 %v615_v19, %v583_v15 }
 0x184   :  { %v359_v22 = vpop.f32.mrb[28].mxu0  ;;  %v439_v23 = vpop.f32.mrb[28].mxu1 }
 0x185   :  { %v568_v27 = vadd.f32 %v1486_v49, %v359_v22  ;;  %706 = vadd.xlane.f32.xlu0 %v1591_v17  ;;  %676 = vadd.xlane.f32.xlu1 %v1593_v20  ;;  %v361_v29 = vpop.f32.mrb[29].mxu0  ;;  %v584_v30 = vadd.f32 %v1486_v49, %v439_v23  ;;  %v441_v33 = vpop.f32.mrb[29].mxu1 }
 0x187   :  { %v1601_v36 = vadd.f32 %v600_v26, %v568_v27  ;;  %v1607_v47 = vadd.f32 %v616_v35, %v584_v30 }
 0x188   :  { %v364_v38 = vpop.f32.mrb[30].mxu0  ;;  %v444_v39 = vpop.f32.mrb[30].mxu1 }
 0x189   :  { %v569_v43 = vadd.f32 %v1486_v49, %v364_v38  ;;  %708 = vadd.xlane.f32.xlu1 %v1599_v32  ;;  %678 = vadd.xlane.f32.xlu0 %v1601_v36  ;;  %v366_v45 = vpop.f32.mrb[31].mxu0  ;;  %v585_v46 = vadd.f32 %v1486_v49, %v444_v39  ;;  %v446_v48 = vpop.f32.mrb[31].mxu1 }
 0x18b   :  { %v1609_v53 = vadd.f32 %v601_v42, %v569_v43  ;;  %v1613_v56 = vadd.f32 %v617_v51, %v585_v46 }
 0x18d   :  { %710 = vadd.xlane.f32.xlu0 %v1607_v47  ;;  %680 = vadd.xlane.f32.xlu1 %v1609_v53 }
 0x191   :  { %712 = vadd.xlane.f32.xlu1 %v1613_v56 }
 0x1de   :  { %v651_v57 = vpop.xlane.xlu0 %650 }
 0x1df   :  { %v715_v59 = vmul.f32 0.0078125, %v651_v57 }
 0x1e1   :  { %v1617_v60 = vsub.f32 %v1490_v58, %v715_v59 }
 0x1e2   :  { %v685_v49 = vpop.xlane.xlu1 %684  ;;  %v683_v61 = vpop.xlane.xlu0 %682 }
 0x1e3   :  { %v731_v62 = vmul.f32 0.0078125, %v683_v61  ;;  %v779_v1 = vmul.f32 %v1617_v60, %v1617_v60  ;;  %v732_v7 = vmul.f32 0.0078125, %v685_v49 }
 0x1e5   :  { %v1622_v5 = vsub.f32 %v1495_v2, %v731_v62  ;;  %811 = vadd.xlane.f32.xlu0 %v779_v1  ;;  %v1633_v19 = vsub.f32 %v1497_v4, %v732_v7 }
 0x1e6   :  { %v653_v8 = vpop.xlane.xlu0 %652  ;;  %v655_v9 = vpop.xlane.xlu1 %654 }
 0x1e7   :  { %v716_v10 = vmul.f32 0.0078125, %v653_v8  ;;  %v717_v13 = vmul.f32 0.0078125, %v655_v9  ;;  %v795_v15 = vmul.f32 %v1622_v5, %v1622_v5  ;;  %v796_v39 = vmul.f32 %v1633_v19, %v1633_v19 }
 0x1e9   :  { %v1627_v58 = vsub.f32 %v1503_v11, %v716_v10  ;;  %v1630_v18 = vsub.f32 %v1505_v14, %v717_v13  ;;  %843 = vadd.xlane.f32.xlu0 %v795_v15 }
 0x1ea   :  { %v687_v2 = vpop.xlane.xlu0 %686  ;;  %v657_v22 = vpop.xlane.xlu1 %656 }
 0x1eb   :  { %v733_v23 = vmul.f32 0.0078125, %v687_v2  ;;  %v718_v26 = vmul.f32 0.0078125, %v657_v22  ;;  %v781_v27 = vmul.f32 %v1630_v18, %v1630_v18  ;;  %v780_v29 = vmul.f32 %v1627_v58, %v1627_v58 }
 0x1ed   :  { %v1640_v11 = vsub.f32 %v1511_v21, %v733_v23  ;;  %815 = vadd.xlane.f32.xlu0 %v781_v27  ;;  %813 = vadd.xlane.f32.xlu1 %v780_v29  ;;  %v1643_v14 = vsub.f32 %v1513_v24, %v718_v26 }
 0x1ee   :  { %v689_v4 = vpop.xlane.xlu1 %688  ;;  %v659_v30 = vpop.xlane.xlu0 %658 }
 0x1ef   :  { %v734_v33 = vmul.f32 0.0078125, %v689_v4  ;;  %v719_v35 = vmul.f32 0.0078125, %v659_v30  ;;  %v797_v38 = vmul.f32 %v1640_v11, %v1640_v11  ;;  %v782_v24 = vmul.f32 %v1643_v14, %v1643_v14 }
 0x1f1   :  { %v1650_v42 = vsub.f32 %v1521_v34, %v719_v35  ;;  %847 = vadd.xlane.f32.xlu0 %v797_v38  ;;  %845 = vadd.xlane.f32.xlu1 %v796_v39  ;;  %v1655_v45 = vsub.f32 %v1519_v31, %v734_v33 }
 0x1f2   :  { %v691_v21 = vpop.xlane.xlu0 %690  ;;  %v661_v43 = vpop.xlane.xlu1 %660 }
 0x1f3   :  { %v735_v46 = vmul.f32 0.0078125, %v691_v21  ;;  %v720_v48 = vmul.f32 0.0078125, %v661_v43  ;;  %v783_v51 = vmul.f32 %v1650_v42, %v1650_v42  ;;  %v798_v1 = vmul.f32 %v1655_v45, %v1655_v45 }
 0x1f5   :  { %v1660_v57 = vsub.f32 %v1527_v41, %v735_v46  ;;  %819 = vadd.xlane.f32.xlu0 %v783_v51  ;;  %817 = vadd.xlane.f32.xlu1 %v782_v24  ;;  %v1663_v34 = vsub.f32 %v1529_v44, %v720_v48 }
 0x1f6   :  { %v693_v59 = vpop.xlane.xlu1 %692  ;;  %v663_v49 = vpop.xlane.xlu0 %662 }
 0x1f7   :  { %v736_v61 = vmul.f32 0.0078125, %v693_v59  ;;  %v721_v62 = vmul.f32 0.0078125, %v663_v49  ;;  %v799_v31 = vmul.f32 %v1660_v57, %v1660_v57  ;;  %v784_v44 = vmul.f32 %v1663_v34, %v1663_v34 }
 0x1f9   :  { %v1670_v7 = vsub.f32 %v1537_v55, %v721_v62  ;;  %851 = vadd.xlane.f32.xlu0 %v799_v31  ;;  %849 = vadd.xlane.f32.xlu1 %v798_v1  ;;  %v1675_v9 = vsub.f32 %v1535_v52, %v736_v61 }
 0x1fa   :  { %v695_v41 = vpop.xlane.xlu0 %694  ;;  %v665_v8 = vpop.xlane.xlu1 %664 }
 0x1fb   :  { %v737_v10 = vmul.f32 0.0078125, %v695_v41  ;;  %v722_v13 = vmul.f32 0.0078125, %v665_v8  ;;  %v785_v15 = vmul.f32 %v1670_v7, %v1670_v7  ;;  %v800_v29 = vmul.f32 %v1675_v9, %v1675_v9 }
 0x1fd   :  { %v1680_v2 = vsub.f32 %v1543_v63, %v737_v10  ;;  %823 = vadd.xlane.f32.xlu0 %v785_v15  ;;  %821 = vadd.xlane.f32.xlu1 %v784_v44  ;;  %v1683_v55 = vsub.f32 %v1545_v3, %v722_v13 }
 0x1fe   :  { %v697_v22 = vpop.xlane.xlu1 %696  ;;  %v667_v23 = vpop.xlane.xlu0 %666 }
 0x1ff   :  { %v738_v26 = vmul.f32 0.0078125, %v697_v22  ;;  %v723_v27 = vmul.f32 0.0078125, %v667_v23  ;;  %v801_v52 = vmul.f32 %v1680_v2, %v1680_v2  ;;  %v786_v3 = vmul.f32 %v1683_v55, %v1683_v55 }
 0x201   :  { %v1690_v4 = vsub.f32 %v1553_v16, %v723_v27  ;;  %855 = vadd.xlane.f32.xlu0 %v801_v52  ;;  %853 = vadd.xlane.f32.xlu1 %v800_v29  ;;  %v1695_v33 = vsub.f32 %v1551_v12, %v738_v26 }
 0x202   :  { %v699_v63 = vpop.xlane.xlu0 %698  ;;  %v669_v30 = vpop.xlane.xlu1 %668 }
 0x203   :  { %v739_v35 = vmul.f32 0.0078125, %v699_v63  ;;  %v724_v38 = vmul.f32 0.0078125, %v669_v30  ;;  %v787_v39 = vmul.f32 %v1690_v4, %v1690_v4  ;;  %v802_v51 = vmul.f32 %v1695_v33, %v1695_v33 }
 0x205   :  { %v1700_v21 = vsub.f32 %v1559_v25, %v739_v35  ;;  %827 = vadd.xlane.f32.xlu0 %v787_v39  ;;  %825 = vadd.xlane.f32.xlu1 %v786_v3  ;;  %v1703_v16 = vsub.f32 %v1561_v28, %v724_v38 }
 0x206   :  { %v701_v43 = vpop.xlane.xlu1 %700  ;;  %v671_v24 = vpop.xlane.xlu0 %670 }
 0x207   :  { %v740_v46 = vmul.f32 0.0078125, %v701_v43  ;;  %v725_v48 = vmul.f32 0.0078125, %v671_v24  ;;  %v803_v12 = vmul.f32 %v1700_v21, %v1700_v21  ;;  %v788_v28 = vmul.f32 %v1703_v16, %v1703_v16 }
 0x209   :  { %v1710_v59 = vsub.f32 %v1569_v40, %v725_v48  ;;  %859 = vadd.xlane.f32.xlu0 %v803_v12  ;;  %857 = vadd.xlane.f32.xlu1 %v802_v51  ;;  %v1715_v61 = vsub.f32 %v1567_v37, %v740_v46 }
 0x20a   :  { %v703_v25 = vpop.xlane.xlu0 %702  ;;  %v673_v49 = vpop.xlane.xlu1 %672 }
 0x20b   :  { %v741_v62 = vmul.f32 0.0078125, %v703_v25  ;;  %v726_v31 = vmul.f32 0.0078125, %v673_v49  ;;  %v789_v1 = vmul.f32 %v1710_v59, %v1710_v59  ;;  %v804_v15 = vmul.f32 %v1715_v61, %v1715_v61 }
 0x20d   :  { %v1720_v41 = vsub.f32 %v1575_v50, %v741_v62  ;;  %831 = vadd.xlane.f32.xlu0 %v789_v1  ;;  %829 = vadd.xlane.f32.xlu1 %v788_v28  ;;  %v1723_v40 = vsub.f32 %v1577_v54, %v726_v31 }
 0x20e   :  { %v705_v8 = vpop.xlane.xlu1 %704  ;;  %v675_v44 = vpop.xlane.xlu0 %674 }
 0x20f   :  { %v742_v10 = vmul.f32 0.0078125, %v705_v8  ;;  %v727_v13 = vmul.f32 0.0078125, %v675_v44  ;;  %v805_v37 = vmul.f32 %v1720_v41, %v1720_v41  ;;  %v790_v54 = vmul.f32 %v1723_v40, %v1723_v40 }
 0x211   :  { %v1730_v22 = vsub.f32 %v1585_v6, %v727_v13  ;;  %863 = vadd.xlane.f32.xlu0 %v805_v37  ;;  %861 = vadd.xlane.f32.xlu1 %v804_v15  ;;  %v1735_v26 = vsub.f32 %v1583_v0, %v742_v10 }
 0x212   :  { %v707_v50 = vpop.xlane.xlu0 %706  ;;  %v677_v23 = vpop.xlane.xlu1 %676 }
 0x213   :  { %v743_v27 = vmul.f32 0.0078125, %v707_v50  ;;  %v728_v52 = vmul.f32 0.0078125, %v677_v23  ;;  %v791_v29 = vmul.f32 %v1730_v22, %v1730_v22  ;;  %v806_v39 = vmul.f32 %v1735_v26, %v1735_v26 }
 0x215   :  { %v1740_v63 = vsub.f32 %v1591_v17, %v743_v27  ;;  %835 = vadd.xlane.f32.xlu0 %v791_v29  ;;  %833 = vadd.xlane.f32.xlu1 %v790_v54  ;;  %v1743_v6 = vsub.f32 %v1593_v20, %v728_v52 }
 0x216   :  { %v709_v30 = vpop.xlane.xlu1 %708  ;;  %v679_v3 = vpop.xlane.xlu0 %678 }
 0x217   :  { %v744_v35 = vmul.f32 0.0078125, %v709_v30  ;;  %v729_v38 = vmul.f32 0.0078125, %v679_v3  ;;  %v807_v0 = vmul.f32 %v1740_v63, %v1740_v63  ;;  %v792_v20 = vmul.f32 %v1743_v6, %v1743_v6  ;;  %v1779_v30 = vld [vmem:[%s1900_s3 + $0x1] ss:$0 sm:$0xff] }
 0x219   :  { %v1750_v43 = vsub.f32 %v1601_v36, %v729_v38  ;;  %867 = vadd.xlane.f32.xlu0 %v807_v0  ;;  %865 = vadd.xlane.f32.xlu1 %v806_v39  ;;  %v1755_v46 = vsub.f32 %v1599_v32, %v744_v35 }
 0x21a   :  { %v711_v17 = vpop.xlane.xlu0 %710  ;;  %v681_v24 = vpop.xlane.xlu1 %680 }
 0x21b   :  { %v745_v48 = vmul.f32 0.0078125, %v711_v17  ;;  %v730_v12 = vmul.f32 0.0078125, %v681_v24  ;;  %v793_v51 = vmul.f32 %v1750_v43, %v1750_v43  ;;  %v808_v32 = vmul.f32 %v1755_v46, %v1755_v46 }
 0x21d   :  { %v1760_v25 = vsub.f32 %v1607_v47, %v745_v48  ;;  %839 = vadd.xlane.f32.xlu0 %v793_v51  ;;  %837 = vadd.xlane.f32.xlu1 %v792_v20  ;;  %v1763_v49 = vsub.f32 %v1609_v53, %v730_v12  ;;  %v1785_v48 = vld [vmem:[%s1900_s3 + $0x2] ss:$0 sm:$0xff]  ;;  %s1383_s3 = smov [#allocation9]  }
 0x21e   :  { %v713_v36 = vpop.xlane.xlu1 %712  ;;  %s1112_s8 = sshll.u32 %s1383_s3, 4  ;;  %s1113_s8 = int_to_ptr.vmem [resolvable:$true] %s1112_s8 }
 0x21f   :  { %v746_v28 = vmul.f32 0.0078125, %v713_v36  ;;  %v809_v62 = vmul.f32 %v1760_v25, %v1760_v25  ;;  %v794_v47 = vmul.f32 %v1763_v49, %v1763_v49  ;;  %s1347_s9 = scalar_lea.vmem %s1113_s8, 4096  ;;  %p1352_p11 = scmp.lt.s32.totalorder %s1113_s8, %s1113_s8 }
 0x220   :  { %p1348_p10 = scmp.ne.s32.totalorder %s1113_s8, %s1347_s9  ;;  %p1353_p12 = scmp.lt.s32.totalorder %s1347_s9, %s1347_s9 }
 0x221   :  { %871 = vadd.xlane.f32.xlu0 %v809_v62  ;;  %869 = vadd.xlane.f32.xlu1 %v808_v32  ;;  %v1770_v31 = vsub.f32 %v1613_v56, %v746_v28 }
 0x222   :  { %p1354_p13 = por %p1353_p12, %p1352_p11 }
 0x223   :  { %v810_v53 = vmul.f32 %v1770_v31, %v1770_v31 }
 0x224   :  { %p1355_p0 = pnand %p1354_p13, %p1348_p10 }
 0x225   :  { %841 = vadd.xlane.f32.xlu1 %v794_v47 }
 0x229   :  { %873 = vadd.xlane.f32.xlu1 %v810_v53 }
 0x272   :  { %v812_v1 = vpop.xlane.xlu0 %811 }
 0x273   :  { %v875_v8 = vmul.f32 0.0078125, %v812_v1 }
 0x275   :  { %v907_v44 = vadd.f32 1e-12, %v875_v8 }
 0x276   :  { %v844_v10 = vpop.xlane.xlu0 %843 }
 0x277   :  { %1217 = vrsqrt.f32 %v907_v44  ;;  %v891_v13 = vmul.f32 0.0078125, %v844_v10 }
 0x279   :  { %v923_v37 = vadd.f32 1e-12, %v891_v13 }
 0x27a   :  { %v816_v15 = vpop.xlane.xlu0 %815  ;;  %v814_v50 = vpop.xlane.xlu1 %813 }
 0x27b   :  { %1219 = vrsqrt.f32 %v923_v37  ;;  %v877_v56 = vmul.f32 0.0078125, %v816_v15  ;;  %v876_v23 = vmul.f32 0.0078125, %v814_v50 }
 0x27d   :  { %v909_v54 = vadd.f32 1e-12, %v877_v56  ;;  %v908_v27 = vadd.f32 1e-12, %v876_v23 }
 0x27e   :  { %v848_v52 = vpop.xlane.xlu0 %847  ;;  %v846_v29 = vpop.xlane.xlu1 %845 }
 0x27f   :  { %1221 = vrsqrt.f32 %v909_v54  ;;  %v893_v3 = vmul.f32 0.0078125, %v848_v52  ;;  %v892_v35 = vmul.f32 0.0078125, %v846_v29 }
 0x280   :  { %1223 = vrsqrt.f32 %v908_v27 }
 0x281   :  { %v1218_v38 = vpop.eup %1217  ;;  %v925_v0 = vadd.f32 1e-12, %v893_v3  ;;  %v924_v39 = vadd.f32 1e-12, %v892_v35 }
 0x282   :  { %v975_v17 = vmul.f32 %v1218_v38, %v1779_v30  ;;  %v820_v24 = vpop.xlane.xlu0 %819  ;;  %v818_v20 = vpop.xlane.xlu1 %817 }
 0x283   :  { %1225 = vrsqrt.f32 %v925_v0  ;;  %v879_v12 = vmul.f32 0.0078125, %v820_v24  ;;  %v878_v51 = vmul.f32 0.0078125, %v818_v20 }
 0x284   :  { %v1007_v36 = vmul.f32 %v975_v17, %v1617_v60  ;;  %1227 = vrsqrt.f32 %v924_v39 }
 0x285   :  { %v1220_v28 = vpop.eup %1219  ;;  %v911_v62 = vadd.f32 1e-12, %v879_v12  ;;  %v910_v32 = vadd.f32 1e-12, %v878_v51 }
 0x286   :  { %v1043_v47 = vadd.f32 %v1785_v48, %v1007_v36  ;;  %v991_v53 = vmul.f32 %v1220_v28, %v1779_v30  ;;  %v852_v1 = vpop.xlane.xlu0 %851  ;;  %v850_v8 = vpop.xlane.xlu1 %849 }
 0x287   :  { %1229 = vrsqrt.f32 %v911_v62  ;;  %v895_v44 = vmul.f32 0.0078125, %v852_v1  ;;  %v894_v10 = vmul.f32 0.0078125, %v850_v8 }
 0x288   :  { %1075 = vst [vmem:[#allocation9] sm:$0xff] %v1043_v47  ;;  %v1023_v13 = vmul.f32 %v991_v53, %v1622_v5  ;;  %1231 = vrsqrt.f32 %v910_v32 }
 0x289   :  { %v1222_v37 = vpop.eup %1221  ;;  %v927_v15 = vadd.f32 1e-12, %v895_v44  ;;  %v926_v60 = vadd.f32 1e-12, %v894_v10 }
 0x28a   :  { %v1224_v50 = vpop.eup %1223  ;;  %v1059_v56 = vadd.f32 %v1785_v48, %v1023_v13  ;;  %v977_v23 = vmul.f32 %v1222_v37, %v1779_v30  ;;  %v824_v54 = vpop.xlane.xlu0 %823 }
 0x28b   :  { %v822_v27 = vpop.xlane.xlu1 %821  ;;  %v976_v52 = vmul.f32 %v1224_v50, %v1779_v30  ;;  %1233 = vrsqrt.f32 %v927_v15  ;;  %v881_v29 = vmul.f32 0.0078125, %v824_v54 }
 0x28c   :  { %v880_v3 = vmul.f32 0.0078125, %v822_v27  ;;  %1091 = vst [vmem:[#allocation9 + $0x80] sm:$0xff] %v1059_v56  ;;  %v1009_v35 = vmul.f32 %v977_v23, %v1630_v18  ;;  %1235 = vrsqrt.f32 %v926_v60 }
 0x28d   :  { %v1226_v5 = vpop.eup %1225  ;;  %v1008_v38 = vmul.f32 %v976_v52, %v1627_v58  ;;  %v913_v0 = vadd.f32 1e-12, %v881_v29 }
 0x28e   :  { %v912_v39 = vadd.f32 1e-12, %v880_v3  ;;  %v1228_v17 = vpop.eup %1227  ;;  %v1045_v24 = vadd.f32 %v1785_v48, %v1009_v35  ;;  %v993_v20 = vmul.f32 %v1226_v5, %v1779_v30  ;;  %v856_v12 = vpop.xlane.xlu0 %855 }
 0x28f   :  { %v854_v51 = vpop.xlane.xlu1 %853  ;;  %v1044_v36 = vadd.f32 %v1785_v48, %v1008_v38  ;;  %v992_v28 = vmul.f32 %v1228_v17, %v1779_v30  ;;  %1237 = vrsqrt.f32 %v913_v0  ;;  %v897_v62 = vmul.f32 0.0078125, %v856_v12 }
 0x290   :  { %1077 = vst [vmem:[#allocation9 + $0x10] sm:$0xff] %v1045_v24  ;;  %v1025_v18 = vmul.f32 %v993_v20, %v1640_v11  ;;  %1239 = vrsqrt.f32 %v912_v39  ;;  %v896_v58 = vmul.f32 0.0078125, %v854_v51 }
 0x291   :  { %v1230_v32 = vpop.eup %1229  ;;  %1076 = vst [vmem:[#allocation9 + $0x8] sm:$0xff] %v1044_v36  ;;  %v1024_v47 = vmul.f32 %v992_v28, %v1633_v19  ;;  %v929_v53 = vadd.f32 1e-12, %v897_v62 }
 0x292   :  { %v1232_v1 = vpop.eup %1231  ;;  %v1061_v8 = vadd.f32 %v1785_v48, %v1025_v18  ;;  %v979_v44 = vmul.f32 %v1230_v32, %v1779_v30  ;;  %v928_v10 = vadd.f32 1e-12, %v896_v58  ;;  %v828_v13 = vpop.xlane.xlu0 %827 }
 0x293   :  { %v826_v37 = vpop.xlane.xlu1 %825  ;;  %v1060_v15 = vadd.f32 %v1785_v48, %v1024_v47  ;;  %v978_v60 = vmul.f32 %v1232_v1, %v1779_v30  ;;  %1241 = vrsqrt.f32 %v929_v53  ;;  %v883_v11 = vmul.f32 0.0078125, %v828_v13 }
 0x294   :  { %1093 = vst [vmem:[#allocation9 + $0x90] sm:$0xff] %v1061_v8  ;;  %v1011_v50 = vmul.f32 %v979_v44, %v1650_v42  ;;  %1243 = vrsqrt.f32 %v928_v10  ;;  %v882_v19 = vmul.f32 0.0078125, %v826_v37 }
 0x295   :  { %v1234_v56 = vpop.eup %1233  ;;  %1092 = vst [vmem:[#allocation9 + $0x88] sm:$0xff] %v1060_v15  ;;  %v1010_v23 = vmul.f32 %v978_v60, %v1643_v14  ;;  %v915_v54 = vadd.f32 1e-12, %v883_v11 }
 0x296   :  { %v1236_v27 = vpop.eup %1235  ;;  %v1047_v52 = vadd.f32 %v1785_v48, %v1011_v50  ;;  %v995_v29 = vmul.f32 %v1234_v56, %v1779_v30  ;;  %v914_v3 = vadd.f32 1e-12, %v882_v19  ;;  %v860_v35 = vpop.xlane.xlu0 %859 }
 0x297   :  { %v858_v5 = vpop.xlane.xlu1 %857  ;;  %v1046_v38 = vadd.f32 %v1785_v48, %v1010_v23  ;;  %v994_v0 = vmul.f32 %v1236_v27, %v1779_v30  ;;  %1245 = vrsqrt.f32 %v915_v54  ;;  %v899_v42 = vmul.f32 0.0078125, %v860_v35 }
 0x298   :  { %1079 = vst [vmem:[#allocation9 + $0x20] sm:$0xff] %v1047_v52  ;;  %v1027_v39 = vmul.f32 %v995_v29, %v1660_v57  ;;  %1247 = vrsqrt.f32 %v914_v3  ;;  %v898_v14 = vmul.f32 0.0078125, %v858_v5 }
 0x299   :  { %v1238_v17 = vpop.eup %1237  ;;  %1078 = vst [vmem:[#allocation9 + $0x18] sm:$0xff] %v1046_v38  ;;  %v1026_v24 = vmul.f32 %v994_v0, %v1655_v45  ;;  %v931_v20 = vadd.f32 1e-12, %v899_v42 }
 0x29a   :  { %v1240_v12 = vpop.eup %1239  ;;  %v1063_v51 = vadd.f32 %v1785_v48, %v1027_v39  ;;  %v981_v36 = vmul.f32 %v1238_v17, %v1779_v30  ;;  %v930_v28 = vadd.f32 1e-12, %v898_v14  ;;  %v832_v62 = vpop.xlane.xlu0 %831 }
 0x29b   :  { %v830_v18 = vpop.xlane.xlu1 %829  ;;  %v1062_v58 = vadd.f32 %v1785_v48, %v1026_v24  ;;  %v980_v32 = vmul.f32 %v1240_v12, %v1779_v30  ;;  %1249 = vrsqrt.f32 %v931_v20  ;;  %v885_v57 = vmul.f32 0.0078125, %v832_v62 }
 0x29c   :  { %1095 = vst [vmem:[#allocation9 + $0xa0] sm:$0xff] %v1063_v51  ;;  %v1013_v47 = vmul.f32 %v981_v36, %v1670_v7  ;;  %1251 = vrsqrt.f32 %v930_v28  ;;  %v884_v45 = vmul.f32 0.0078125, %v830_v18 }
 0x29d   :  { %v1242_v53 = vpop.eup %1241  ;;  %1094 = vst [vmem:[#allocation9 + $0x98] sm:$0xff] %v1062_v58  ;;  %v1012_v1 = vmul.f32 %v980_v32, %v1663_v34  ;;  %v917_v8 = vadd.f32 1e-12, %v885_v57 }
 0x29e   :  { %v1244_v44 = vpop.eup %1243  ;;  %v1049_v10 = vadd.f32 %v1785_v48, %v1013_v47  ;;  %v997_v13 = vmul.f32 %v1242_v53, %v1779_v30  ;;  %v916_v37 = vadd.f32 1e-12, %v884_v45  ;;  %v864_v15 = vpop.xlane.xlu0 %863 }
 0x29f   :  { %v862_v60 = vpop.xlane.xlu1 %861  ;;  %v1048_v11 = vadd.f32 %v1785_v48, %v1012_v1  ;;  %v996_v50 = vmul.f32 %v1244_v44, %v1779_v30  ;;  %1253 = vrsqrt.f32 %v917_v8  ;;  %v901_v7 = vmul.f32 0.0078125, %v864_v15 }
 0x2a0   :  { %1081 = vst [vmem:[#allocation9 + $0x30] sm:$0xff] %v1049_v10  ;;  %v1029_v19 = vmul.f32 %v997_v13, %v1680_v2  ;;  %1255 = vrsqrt.f32 %v916_v37  ;;  %v900_v34 = vmul.f32 0.0078125, %v862_v60 }
 0x2a1   :  { %v1246_v56 = vpop.eup %1245  ;;  %1080 = vst [vmem:[#allocation9 + $0x28] sm:$0xff] %v1048_v11  ;;  %v1028_v23 = vmul.f32 %v996_v50, %v1675_v9  ;;  %v933_v54 = vadd.f32 1e-12, %v901_v7 }
 0x2a2   :  { %v1248_v27 = vpop.eup %1247  ;;  %v1065_v52 = vadd.f32 %v1785_v48, %v1029_v19  ;;  %v983_v29 = vmul.f32 %v1246_v56, %v1779_v30  ;;  %v932_v3 = vadd.f32 1e-12, %v900_v34  ;;  %v836_v35 = vpop.xlane.xlu0 %835 }
 0x2a3   :  { %v834_v5 = vpop.xlane.xlu1 %833  ;;  %v1064_v38 = vadd.f32 %v1785_v48, %v1028_v23  ;;  %v982_v0 = vmul.f32 %v1248_v27, %v1779_v30  ;;  %1257 = vrsqrt.f32 %v933_v54  ;;  %v887_v2 = vmul.f32 0.0078125, %v836_v35 }
 0x2a4   :  { %1097 = vst [vmem:[#allocation9 + $0xb0] sm:$0xff] %v1065_v52  ;;  %v1015_v42 = vmul.f32 %v983_v29, %v1690_v4  ;;  %1259 = vrsqrt.f32 %v932_v3  ;;  %v886_v9 = vmul.f32 0.0078125, %v834_v5 }
 0x2a5   :  { %v1250_v39 = vpop.eup %1249  ;;  %1096 = vst [vmem:[#allocation9 + $0xa8] sm:$0xff] %v1064_v38  ;;  %v1014_v14 = vmul.f32 %v982_v0, %v1683_v55  ;;  %v919_v17 = vadd.f32 1e-12, %v887_v2 }
 0x2a6   :  { %v1252_v24 = vpop.eup %1251  ;;  %v1051_v20 = vadd.f32 %v1785_v48, %v1015_v42  ;;  %v999_v12 = vmul.f32 %v1250_v39, %v1779_v30  ;;  %v918_v51 = vadd.f32 1e-12, %v886_v9  ;;  %v868_v36 = vpop.xlane.xlu0 %867 }
 0x2a7   :  { %v866_v28 = vpop.xlane.xlu1 %865  ;;  %v1050_v62 = vadd.f32 %v1785_v48, %v1014_v14  ;;  %v998_v18 = vmul.f32 %v1252_v24, %v1779_v30  ;;  %1261 = vrsqrt.f32 %v919_v17  ;;  %v903_v4 = vmul.f32 0.0078125, %v868_v36 }
 0x2a8   :  { %1083 = vst [vmem:[#allocation9 + $0x40] sm:$0xff] %v1051_v20  ;;  %v1031_v58 = vmul.f32 %v999_v12, %v1700_v21  ;;  %1263 = vrsqrt.f32 %v918_v51  ;;  %v902_v55 = vmul.f32 0.0078125, %v866_v28 }
 0x2a9   :  { %v1254_v32 = vpop.eup %1253  ;;  %1082 = vst [vmem:[#allocation9 + $0x38] sm:$0xff] %v1050_v62  ;;  %v1030_v57 = vmul.f32 %v998_v18, %v1695_v33  ;;  %v935_v47 = vadd.f32 1e-12, %v903_v4 }
 0x2aa   :  { %v1256_v45 = vpop.eup %1255  ;;  %v1067_v53 = vadd.f32 %v1785_v48, %v1031_v58  ;;  %v985_v1 = vmul.f32 %v1254_v32, %v1779_v30  ;;  %v934_v8 = vadd.f32 1e-12, %v902_v55  ;;  %v840_v44 = vpop.xlane.xlu0 %839 }
 0x2ab   :  { %v838_v10 = vpop.xlane.xlu1 %837  ;;  %v1066_v13 = vadd.f32 %v1785_v48, %v1030_v57  ;;  %v984_v37 = vmul.f32 %v1256_v45, %v1779_v30  ;;  %1265 = vrsqrt.f32 %v935_v47  ;;  %v889_v21 = vmul.f32 0.0078125, %v840_v44 }
 0x2ac   :  { %1099 = vst [vmem:[#allocation9 + $0xc0] sm:$0xff] %v1067_v53  ;;  %v1017_v15 = vmul.f32 %v985_v1, %v1710_v59  ;;  %1267 = vrsqrt.f32 %v934_v8  ;;  %v888_v33 = vmul.f32 0.0078125, %v838_v10 }
 0x2ad   :  { %v1258_v60 = vpop.eup %1257  ;;  %1098 = vst [vmem:[#allocation9 + $0xb8] sm:$0xff] %v1066_v13  ;;  %v1016_v11 = vmul.f32 %v984_v37, %v1703_v16  ;;  %v921_v50 = vadd.f32 1e-12, %v889_v21 }
 0x2ae   :  { %v1260_v7 = vpop.eup %1259  ;;  %v1053_v19 = vadd.f32 %v1785_v48, %v1017_v15  ;;  %v1001_v34 = vmul.f32 %v1258_v60, %v1779_v30  ;;  %v920_v56 = vadd.f32 1e-12, %v888_v33  ;;  %v872_v23 = vpop.xlane.xlu0 %871 }
 0x2af   :  { %v870_v54 = vpop.xlane.xlu1 %869  ;;  %v1052_v27 = vadd.f32 %v1785_v48, %v1016_v11  ;;  %v1000_v52 = vmul.f32 %v1260_v7, %v1779_v30  ;;  %1269 = vrsqrt.f32 %v921_v50  ;;  %v905_v59 = vmul.f32 0.0078125, %v872_v23 }
 0x2b0   :  { %1085 = vst [vmem:[#allocation9 + $0x50] sm:$0xff] %v1053_v19  ;;  %v1033_v29 = vmul.f32 %v1001_v34, %v1720_v41  ;;  %1271 = vrsqrt.f32 %v920_v56  ;;  %v904_v16 = vmul.f32 0.0078125, %v870_v54 }
 0x2b1   :  { %v1262_v3 = vpop.eup %1261  ;;  %1084 = vst [vmem:[#allocation9 + $0x48] sm:$0xff] %v1052_v27  ;;  %v1032_v35 = vmul.f32 %v1000_v52, %v1715_v61  ;;  %v937_v5 = vadd.f32 1e-12, %v905_v59 }
 0x2b2   :  { %v1264_v38 = vpop.eup %1263  ;;  %v1069_v0 = vadd.f32 %v1785_v48, %v1033_v29  ;;  %v987_v2 = vmul.f32 %v1262_v3, %v1779_v30  ;;  %v936_v42 = vadd.f32 1e-12, %v904_v16 }
 0x2b3   :  { %v842_v9 = vpop.xlane.xlu1 %841  ;;  %v1068_v39 = vadd.f32 %v1785_v48, %v1032_v35  ;;  %v986_v14 = vmul.f32 %v1264_v38, %v1779_v30  ;;  %1273 = vrsqrt.f32 %v937_v5 }
 0x2b4   :  { %v890_v41 = vmul.f32 0.0078125, %v842_v9  ;;  %1101 = vst [vmem:[#allocation9 + $0xd0] sm:$0xff] %v1069_v0  ;;  %v1019_v17 = vmul.f32 %v987_v2, %v1730_v22  ;;  %1275 = vrsqrt.f32 %v936_v42 }
 0x2b5   :  { %v1266_v24 = vpop.eup %1265  ;;  %1100 = vst [vmem:[#allocation9 + $0xc8] sm:$0xff] %v1068_v39  ;;  %v1018_v61 = vmul.f32 %v986_v14, %v1723_v40 }
 0x2b6   :  { %v922_v20 = vadd.f32 1e-12, %v890_v41  ;;  %v1268_v12 = vpop.eup %1267  ;;  %v1055_v51 = vadd.f32 %v1785_v48, %v1019_v17  ;;  %v1003_v36 = vmul.f32 %v1266_v24, %v1779_v30 }
 0x2b7   :  { %v874_v28 = vpop.xlane.xlu1 %873  ;;  %v1054_v62 = vadd.f32 %v1785_v48, %v1018_v61  ;;  %v1002_v18 = vmul.f32 %v1268_v12, %v1779_v30 }
 0x2b8   :  { %1277 = vrsqrt.f32 %v922_v20  ;;  %v906_v4 = vmul.f32 0.0078125, %v874_v28  ;;  %1087 = vst [vmem:[#allocation9 + $0x60] sm:$0xff] %v1055_v51  ;;  %v1035_v22 = vmul.f32 %v1003_v36, %v1740_v63 }
 0x2b9   :  { %v1270_v58 = vpop.eup %1269  ;;  %1086 = vst [vmem:[#allocation9 + $0x58] sm:$0xff] %v1054_v62  ;;  %v1034_v40 = vmul.f32 %v1002_v18, %v1735_v26 }
 0x2ba   :  { %v938_v55 = vadd.f32 1e-12, %v906_v4  ;;  %v1272_v32 = vpop.eup %1271  ;;  %v1071_v57 = vadd.f32 %v1785_v48, %v1035_v22  ;;  %v989_v47 = vmul.f32 %v1270_v58, %v1779_v30 }
 0x2bb   :  { %v1070_v45 = vadd.f32 %v1785_v48, %v1034_v40  ;;  %v988_v53 = vmul.f32 %v1272_v32, %v1779_v30 }
 0x2bc   :  { %1279 = vrsqrt.f32 %v938_v55  ;;  %1103 = vst [vmem:[#allocation9 + $0xe0] sm:$0xff] %v1071_v57  ;;  %v1021_v1 = vmul.f32 %v989_v47, %v1750_v43 }
 0x2bd   :  { %v1274_v8 = vpop.eup %1273  ;;  %1102 = vst [vmem:[#allocation9 + $0xd8] sm:$0xff] %v1070_v45  ;;  %v1020_v63 = vmul.f32 %v988_v53, %v1743_v6 }
 0x2be   :  { %v1276_v44 = vpop.eup %1275  ;;  %v1057_v26 = vadd.f32 %v1785_v48, %v1021_v1  ;;  %v1005_v10 = vmul.f32 %v1274_v8, %v1779_v30 }
 0x2bf   :  { %v1056_v13 = vadd.f32 %v1785_v48, %v1020_v63  ;;  %v1004_v37 = vmul.f32 %v1276_v44, %v1779_v30 }
 0x2c0   :  { %1089 = vst [vmem:[#allocation9 + $0x70] sm:$0xff] %v1057_v26  ;;  %v1037_v21 = vmul.f32 %v1005_v10, %v1760_v25 }
 0x2c1   :  { %1088 = vst [vmem:[#allocation9 + $0x68] sm:$0xff] %v1056_v13  ;;  %v1036_v43 = vmul.f32 %v1004_v37, %v1755_v46 }
 0x2c2   :  { %v1278_v15 = vpop.eup %1277  ;;  %v1073_v33 = vadd.f32 %v1785_v48, %v1037_v21 }
 0x2c3   :  { %v990_v6 = vmul.f32 %v1278_v15, %v1779_v30  ;;  %v1072_v60 = vadd.f32 %v1785_v48, %v1036_v43 }
 0x2c4   :  { %1105 = vst [vmem:[#allocation9 + $0xf0] sm:$0xff] %v1073_v33 }
 0x2c5   :  { %v1022_v11 = vmul.f32 %v990_v6, %v1763_v49  ;;  %1104 = vst [vmem:[#allocation9 + $0xe8] sm:$0xff] %v1072_v60 }
 0x2c6   :  { %v1280_v50 = vpop.eup %1279 }
 0x2c7   :  { %v1058_v7 = vadd.f32 %v1785_v48, %v1022_v11  ;;  %v1006_v19 = vmul.f32 %v1280_v50, %v1779_v30 }
 0x2c9   :  { %1090 = vst [vmem:[#allocation9 + $0x78] sm:$0xff] %v1058_v7  ;;  %v1038_v46 = vmul.f32 %v1006_v19, %v1770_v31 }
 0x2cb   :  { %v1074_v25 = vadd.f32 %v1785_v48, %v1038_v46 }
 0x2cd   :  { %1106 = vst [vmem:[#allocation9 + $0xf8] sm:$0xff] %v1074_v25 }
 0x2ce   :  { %1358 = shalt.err (!%p1355_p0)
}
 0x2cf   :  { %s1359_s12 = scalar_lea.hbm %s1901_s4, 4096 }
 0x2d0   :  { %p1360_p1 = scmp.ne.s32.totalorder %s1901_s4, %s1359_s12  ;;  %p1363_p2 = scmp.lt.u32.totalorder %s1359_s12, %s1901_s4 }
 0x2d2   :  { %p1365_p3 = pnand %p1363_p2, %p1360_p1 }
 0x2d4   :  { %1368 = shalt.err (!%p1365_p3)
}
 0x2d5   :  { %1118 = dma.vmem_to_hbm [thread:$0]  %s1113_s8, 4096, %s1901_s4, [#allocation5], %s1376_s25, %s1376_s25, %s1377_s26  }
 0x2d6   :  { %1373 = dma.done.wait [#allocation5], 4096  }
 0x2d7   :  { %1374 = vsyncadd [#allocation5], 4294963200 }
 0x2d8   :  { %1122 = vsyncpa [#allocation4], 1 }
 0x2d9   :  { %1123 = vsyncpa [#allocation7], 1 }
 0x2da   :  { %1124 = vsyncpa [#allocation5], 1 }

</bundles_post_ra>
